<compile_context>
chip_gen: v5e
topology: v5e:2x2
jax: 0.10.0
libtpu: 0.0.40
codegen_flags: <defaults>
</compile_context>

<pallas_src>
from functools import partial
import math

import jax
import jax.numpy as jnp
from jax import lax
from jax.experimental import pallas as pl
from jax.experimental.pallas import tpu as pltpu


_LANE = 128
_NEG_BIG = -1e9  # "minus infinity" bias for padded classes


def _round_up(n, m):
    return ((n + m - 1) // m) * m


def _vmem_limit_bytes():
    # v5e/v6e have 128 MiB of VMEM, v7x only 64 MiB; cap at ~3/4 of physical
    # so the compiler keeps headroom.  Fall back to a safe 48 MiB.
    try:
        cap = int(pltpu.get_tpu_info().vmem_capacity_bytes)
    except Exception:
        cap = 64 * 1024 * 1024
    return (cap * 3) // 4


def _pick_tb(batch, dp, vmem_budget):
    """Batch tile: big for MXU occupancy, multiple of 16 (bf16 sublane pack),
    >= 2 grid tiles when the batch allows it (v7x has 2 TensorCores), and
    bounded so per-tile streams + f32 carries stay well inside VMEM."""
    if batch <= 16:
        tb = 16
    else:
        tb = min(256, _round_up(-(-batch // 2), 16))
    # ~16 B/elem per tile: x,d bf16 double-buffered (8) + f32 d carry & grad (8)
    while tb > 16 and tb * dp * 16 > vmem_budget // 2:
        tb //= 2
    return tb


# ------------------------------ fused kernel ------------------------------- #

def _vat_kernel(x_ref, d0_ref, w_ref, b_ref, kl_ref,
                *, xi, eps, ip, n_valid_rows, inv_bsz):
    """Fused VAT for one batch tile.

    x_ref  : (TB, Dp) bf16  flattened input tile (zero-padded if needed)
    d0_ref : (TB, Dp) bf16  random direction tile
    w_ref  : (Dp, Kp) bf16  weights (VMEM-resident, single-buffered)
    b_ref  : (1,  Kp) f32   bias; padded classes hold -1e9
    kl_ref : (1, 1)   f32   SMEM per-tile KL partial (already divided by B)
    """
    tb = x_ref.shape[0]

    w = w_ref[...]
    b = b_ref[...]

    # Base logits computed once (model is linear: (x+s*d)@W+b = base + s*(d@W)).
    base = jnp.dot(x_ref[...], w, preferred_element_type=jnp.float32) + b

    # pred = softmax(base); padded classes have logit -1e9 -> probability 0.
    e0 = jnp.exp(base - jnp.max(base, axis=-1, keepdims=True))
    pred = e0 * pl.reciprocal(jnp.sum(e0, axis=-1, keepdims=True), approx=True)

    # Mask for padded batch rows of this tile.
    row_ids = pl.program_id(0) * tb + lax.broadcasted_iota(jnp.int32, (tb, 1), 0)
    valid = row_ids < n_valid_rows                      # (tb, 1) bool

    def l2_normalize(d):
        nrm = jnp.sqrt(jnp.sum(d * d, axis=-1, keepdims=True))
        return d * pl.reciprocal(nrm + 1e-8, approx=True)

    def perturbed_softmax_stats(d_bf16, scale):
        # logits(x + scale*d) = base + scale*(d @ W)   (model is linear)
        z = base + jnp.float32(scale) * jnp.dot(
            d_bf16, w, preferred_element_type=jnp.float32)
        zc = z - jnp.max(z, axis=-1, keepdims=True)
        ez = jnp.exp(zc)
        sz = jnp.sum(ez, axis=-1, keepdims=True)
        return zc, ez, sz

    d = l2_normalize(d0_ref[...].astype(jnp.float32))

    def power_iter(_, d):
        _, ez, sz = perturbed_softmax_stats(d.astype(jnp.bfloat16), xi)
        p_hat = ez * pl.reciprocal(sz, approx=True)
        # d KL / d logits  ∝ (softmax - pred); the xi and 1/B chain-rule
        # factors are dropped: l2_normalize is scale-invariant per row.
        g = jnp.where(valid, p_hat - pred, 0.0)
        # d KL / d d  ∝  g @ W^T  (transposed-RHS contraction, no W^T copy)
        gd = lax.dot_general(g.astype(jnp.bfloat16), w,
                             dimension_numbers=(((1,), (1,)), ((), ())),
                             preferred_element_type=jnp.float32)
        return l2_normalize(gd)

    d = lax.fori_loop(0, ip, power_iter, d, unroll=True)

    # lds = KL(pred || softmax(base + eps*(d@W))), batchmean, xlogy semantics
    # (zero-probability targets contribute exactly 0 — matches F.kl_div).
    zc, _, sz = perturbed_softmax_stats(d.astype(jnp.bfloat16), eps)
    logp_hat = zc - jnp.log(sz)
    safe_pred = jnp.where(pred > 0.0, pred, 1.0)
    terms = jnp.where(jnp.logical_and(valid, pred > 0.0),
                      pred * (jnp.log(safe_pred) - logp_hat), 0.0)
    kl_ref[0, 0] = jnp.sum(terms) * jnp.float32(inv_bsz)


# --------------------------------- wrapper --------------------------------- #

def vat_loss(x, W, b, d_init, xi=10.0, eps=1.0, ip=1):
    f32, bf16 = jnp.float32, jnp.bfloat16

    B = x.shape[0]
    D = int(math.prod(x.shape[1:]))
    K = W.shape[-1]

    Dp = _round_up(D, _LANE)
    Kp = _round_up(K, _LANE)

    vmem_limit = _vmem_limit_bytes()
    TB = _pick_tb(B, Dp, vmem_limit)
    Bp = _round_up(B, TB)
    n_tiles = Bp // TB

    # Cast straight to bf16; only pad (one cheap copy) when shapes need it.
    x_flat = x.reshape(B, D).astype(bf16)
    d_flat = d_init.reshape(B, D).astype(bf16)
    if Bp != B or Dp != D:
        x_p = jnp.pad(x_flat, ((0, Bp - B), (0, Dp - D)))
        d_p = jnp.pad(d_flat, ((0, Bp - B), (0, Dp - D)))
    else:
        x_p, d_p = x_flat, d_flat

    # Pad class dim of W with zero columns and the bias with a large negative
    # constant (padded classes get probability exactly 0).
    w_bf = W.astype(bf16)
    w_p = jnp.pad(w_bf, ((0, Dp - D), (0, Kp - K))) if (Dp != D or Kp != K) else w_bf
    b_p = jnp.full((1, Kp), _NEG_BIG, f32).at[:, :K].set(
        jnp.reshape(b, (1, K)).astype(f32))

    kernel = partial(_vat_kernel, xi=float(xi), eps=float(eps), ip=int(ip),
                     n_valid_rows=B, inv_bsz=1.0 / float(B))

    flops = 2 * Bp * Dp * Kp * (2 + 2 * int(ip))
    transcendentals = (int(ip) + 2) * Bp * Kp * 2
    bytes_accessed = (x_p.size * 2 + d_p.size * 2 + w_p.size * 2
                      + b_p.size * 4 + n_tiles * 4)

    kl_parts = pl.pallas_call(
        kernel,
        out_shape=jax.ShapeDtypeStruct((n_tiles, 1), f32),
        grid=(n_tiles,),
        in_specs=[
            pl.BlockSpec((TB, Dp), lambda i: (i, 0)),      # x tile
            pl.BlockSpec((TB, Dp), lambda i: (i, 0)),      # d_init tile
            pl.BlockSpec((Dp, Kp), lambda i: (0, 0),       # W (resident,
                         pipeline_mode=pl.Buffered(1)),    #   single-buffered)
            pl.BlockSpec((1, Kp), lambda i: (0, 0),        # bias (resident)
                         pipeline_mode=pl.Buffered(1)),
        ],
        out_specs=pl.BlockSpec((1, 1), lambda i: (i, 0),
                               memory_space=pltpu.MemorySpace.SMEM),
        compiler_params=pltpu.CompilerParams(
            dimension_semantics=("parallel",),
            vmem_limit_bytes=int(vmem_limit),
        ),
        cost_estimate=pl.CostEstimate(flops=flops,
                                      transcendentals=transcendentals,
                                      bytes_accessed=bytes_accessed),
    )(x_p, d_p, w_p, b_p)

    return jnp.sum(kl_parts)   # tiny cross-tile reduction, already / batch


# ----------------------------------- main ----------------------------------- #

if __name__ == "__main__":
    key = jax.random.PRNGKey(0)
    kx, kw, kb, kd = jax.random.split(key, 4)

    B, C, H, Wsp, K = 2, 4, 16, 16, 8
    D = C * H * Wsp

    x = jax.random.normal(kx, (B, C, H, Wsp), dtype=jnp.float32)
    # deterministic synthetic "model" parameters (linear classifier)
    W = 0.02 * jax.random.normal(kw, (D, K), dtype=jnp.float32)
    b = 0.01 * jax.random.normal(kb, (1, K), dtype=jnp.float32)
    # the random direction d (torch.randn_like(x))
    d0 = jax.random.normal(kd, (B, C, H, Wsp), dtype=jnp.float32)

    vat_fn = jax.jit(partial(vat_loss, xi=10.0, eps=1.0, ip=1))
    lds = vat_fn(x, W, b, d0)
    jax.block_until_ready(lds)
    assert lds.shape == () and bool(jnp.isfinite(lds))
    print("KERNEL_OK")
</pallas_src>

<mosaic_0001>
module attributes {stable_mosaic.version = 11 : i64} {
  func.func @_vat_kernel(%arg0: i32, %arg1: memref<16x1024xbf16, #tpu.memory_space<vmem>>, %arg2: memref<16x1024xbf16, #tpu.memory_space<vmem>>, %arg3: memref<1024x128xbf16, #tpu.memory_space<vmem>>, %arg4: memref<1x128xf32, #tpu.memory_space<vmem>>, %arg5: memref<1x1xf32, #tpu.memory_space<smem>>) attributes {dimension_semantics = [#tpu.dimension_semantics<parallel>], iteration_bounds = array<i64: 1>, scalar_prefetch = 0 : i64, scratch_operands = 0 : i64, tpu.core_type = #tpu.core_type<tc>, window_params = [{transform_indices = @transform_0, window_bounds = array<i64: 16, 1024>}, {transform_indices = @transform_1, window_bounds = array<i64: 16, 1024>}, {pipeline_mode = #tpu.pipeline_mode<synchronous>, transform_indices = @transform_2, window_bounds = array<i64: 1024, 128>}, {pipeline_mode = #tpu.pipeline_mode<synchronous>, transform_indices = @transform_3, window_bounds = array<i64: 1, 128>}, {transform_indices = @transform_4, window_bounds = array<i64: 1, 1>}]} {
    %c0 = arith.constant 0 : index
    %c0_0 = arith.constant 0 : index
    %0 = vector.load %arg3[%c0, %c0_0] : memref<1024x128xbf16, #tpu.memory_space<vmem>>, vector<1024x128xbf16>
    %c0_1 = arith.constant 0 : index
    %c0_2 = arith.constant 0 : index
    %1 = vector.load %arg4[%c0_1, %c0_2] : memref<1x128xf32, #tpu.memory_space<vmem>>, vector<1x128xf32>
    %c0_3 = arith.constant 0 : index
    %c0_4 = arith.constant 0 : index
    %2 = vector.load %arg1[%c0_3, %c0_4] : memref<16x1024xbf16, #tpu.memory_space<vmem>>, vector<16x1024xbf16>
    %cst = arith.constant dense<0.000000e+00> : vector<16x128xf32>
    %3 = tpu.matmul %2, %0, %cst {dimension_numbers = #tpu.dot_dimension_numbers<[1], [0], [0], [1], [0, 0, 1, 1], [], []>} : vector<16x1024xbf16>, vector<1024x128xbf16>, vector<16x128xf32> -> vector<16x128xf32>
    %4 = vector.broadcast %1 : vector<1x128xf32> to vector<16x128xf32>
    %5 = arith.addf %3, %4 : vector<16x128xf32>
    %cst_5 = arith.constant dense<0xFF800000> : vector<16xf32>
    %6 = vector.multi_reduction <maximumf>, %5, %cst_5 [1] : vector<16x128xf32> to vector<16xf32>
    %7 = vector.shape_cast %6 : vector<16xf32> to vector<16x1xf32>
    %8 = vector.broadcast %7 : vector<16x1xf32> to vector<16x128xf32>
    %9 = arith.subf %5, %8 : vector<16x128xf32>
    %10 = math.exp %9 : vector<16x128xf32>
    %cst_6 = arith.constant dense<0.000000e+00> : vector<16xf32>
    %11 = vector.multi_reduction <add>, %10, %cst_6 [1] : vector<16x128xf32> to vector<16xf32>
    %12 = vector.shape_cast %11 : vector<16xf32> to vector<16x1xf32>
    %13 = tpu.reciprocal %12 {approx = true} : vector<16x1xf32> -> vector<16x1xf32>
    %14 = vector.broadcast %13 : vector<16x1xf32> to vector<16x128xf32>
    %15 = arith.mulf %10, %14 : vector<16x128xf32>
    %c16_i32 = arith.constant 16 : i32
    %16 = arith.muli %arg0, %c16_i32 : i32
    %17 = tpu.iota {dimensions = array<i32: 0>} : vector<16x1xi32>
    %18 = vector.broadcast %16 : i32 to vector<16x1xi32>
    %19 = arith.addi %18, %17 : vector<16x1xi32>
    %c2_i32 = arith.constant 2 : i32
    %20 = vector.broadcast %c2_i32 : i32 to vector<16x1xi32>
    %21 = arith.cmpi slt, %19, %20 : vector<16x1xi32>
    %c0_7 = arith.constant 0 : index
    %c0_8 = arith.constant 0 : index
    %22 = vector.load %arg2[%c0_7, %c0_8] : memref<16x1024xbf16, #tpu.memory_space<vmem>>, vector<16x1024xbf16>
    %23 = arith.extf %22 : vector<16x1024xbf16> to vector<16x1024xf32>
    %24 = arith.mulf %23, %23 : vector<16x1024xf32>
    %cst_9 = arith.constant dense<0.000000e+00> : vector<16xf32>
    %25 = vector.multi_reduction <add>, %24, %cst_9 [1] : vector<16x1024xf32> to vector<16xf32>
    %26 = vector.shape_cast %25 : vector<16xf32> to vector<16x1xf32>
    %27 = math.sqrt %26 : vector<16x1xf32>
    %cst_10 = arith.constant 9.99999993E-9 : f32
    %28 = vector.broadcast %cst_10 : f32 to vector<16x1xf32>
    %29 = arith.addf %27, %28 : vector<16x1xf32>
    %30 = tpu.reciprocal %29 {approx = true} : vector<16x1xf32> -> vector<16x1xf32>
    %31 = vector.broadcast %30 : vector<16x1xf32> to vector<16x1024xf32>
    %32 = arith.mulf %23, %31 : vector<16x1024xf32>
    %c0_i32 = arith.constant 0 : i32
    %33 = arith.truncf %32 : vector<16x1024xf32> to vector<16x1024xbf16>
    %cst_11 = arith.constant dense<0.000000e+00> : vector<16x128xf32>
    %34 = tpu.matmul %33, %0, %cst_11 {dimension_numbers = #tpu.dot_dimension_numbers<[1], [0], [0], [1], [0, 0, 1, 1], [], []>} : vector<16x1024xbf16>, vector<1024x128xbf16>, vector<16x128xf32> -> vector<16x128xf32>
    %cst_12 = arith.constant 1.000000e+01 : f32
    %35 = vector.broadcast %cst_12 : f32 to vector<16x128xf32>
    %36 = arith.mulf %35, %34 : vector<16x128xf32>
    %37 = arith.addf %5, %36 : vector<16x128xf32>
    %cst_13 = arith.constant dense<0xFF800000> : vector<16xf32>
    %38 = vector.multi_reduction <maximumf>, %37, %cst_13 [1] : vector<16x128xf32> to vector<16xf32>
    %39 = vector.shape_cast %38 : vector<16xf32> to vector<16x1xf32>
    %40 = vector.broadcast %39 : vector<16x1xf32> to vector<16x128xf32>
    %41 = arith.subf %37, %40 : vector<16x128xf32>
    %42 = math.exp %41 : vector<16x128xf32>
    %cst_14 = arith.constant dense<0.000000e+00> : vector<16xf32>
    %43 = vector.multi_reduction <add>, %42, %cst_14 [1] : vector<16x128xf32> to vector<16xf32>
    %44 = vector.shape_cast %43 : vector<16xf32> to vector<16x1xf32>
    %45 = tpu.reciprocal %44 {approx = true} : vector<16x1xf32> -> vector<16x1xf32>
    %46 = vector.broadcast %45 : vector<16x1xf32> to vector<16x128xf32>
    %47 = arith.mulf %42, %46 : vector<16x128xf32>
    %48 = arith.subf %47, %15 : vector<16x128xf32>
    %cst_15 = arith.constant 0.000000e+00 : f32
    %49 = vector.shape_cast %21 : vector<16x1xi1> to vector<16x1xi1>
    %50 = vector.broadcast %49 : vector<16x1xi1> to vector<16x128xi1>
    %51 = vector.broadcast %cst_15 : f32 to vector<16x128xf32>
    %52 = arith.select %50, %48, %51 : vector<16x128xi1>, vector<16x128xf32>
    %53 = arith.truncf %52 : vector<16x128xf32> to vector<16x128xbf16>
    %cst_16 = arith.constant dense<0.000000e+00> : vector<16x1024xf32>
    %54 = tpu.matmul %53, %0, %cst_16 {dimension_numbers = #tpu.dot_dimension_numbers<[1], [1], [0], [0], [0, 0, 1, 0], [], []>} : vector<16x128xbf16>, vector<1024x128xbf16>, vector<16x1024xf32> -> vector<16x1024xf32>
    %55 = arith.mulf %54, %54 : vector<16x1024xf32>
    %cst_17 = arith.constant dense<0.000000e+00> : vector<16xf32>
    %56 = vector.multi_reduction <add>, %55, %cst_17 [1] : vector<16x1024xf32> to vector<16xf32>
    %57 = vector.shape_cast %56 : vector<16xf32> to vector<16x1xf32>
    %58 = math.sqrt %57 : vector<16x1xf32>
    %cst_18 = arith.constant 9.99999993E-9 : f32
    %59 = vector.broadcast %cst_18 : f32 to vector<16x1xf32>
    %60 = arith.addf %58, %59 : vector<16x1xf32>
    %61 = tpu.reciprocal %60 {approx = true} : vector<16x1xf32> -> vector<16x1xf32>
    %62 = vector.broadcast %61 : vector<16x1xf32> to vector<16x1024xf32>
    %63 = arith.mulf %54, %62 : vector<16x1024xf32>
    %64 = arith.truncf %63 : vector<16x1024xf32> to vector<16x1024xbf16>
    %cst_19 = arith.constant dense<0.000000e+00> : vector<16x128xf32>
    %65 = tpu.matmul %64, %0, %cst_19 {dimension_numbers = #tpu.dot_dimension_numbers<[1], [0], [0], [1], [0, 0, 1, 1], [], []>} : vector<16x1024xbf16>, vector<1024x128xbf16>, vector<16x128xf32> -> vector<16x128xf32>
    %cst_20 = arith.constant 1.000000e+00 : f32
    %66 = vector.broadcast %cst_20 : f32 to vector<16x128xf32>
    %67 = arith.mulf %66, %65 : vector<16x128xf32>
    %68 = arith.addf %5, %67 : vector<16x128xf32>
    %cst_21 = arith.constant dense<0xFF800000> : vector<16xf32>
    %69 = vector.multi_reduction <maximumf>, %68, %cst_21 [1] : vector<16x128xf32> to vector<16xf32>
    %70 = vector.shape_cast %69 : vector<16xf32> to vector<16x1xf32>
    %71 = vector.broadcast %70 : vector<16x1xf32> to vector<16x128xf32>
    %72 = arith.subf %68, %71 : vector<16x128xf32>
    %73 = math.exp %72 : vector<16x128xf32>
    %cst_22 = arith.constant dense<0.000000e+00> : vector<16xf32>
    %74 = vector.multi_reduction <add>, %73, %cst_22 [1] : vector<16x128xf32> to vector<16xf32>
    %75 = vector.shape_cast %74 : vector<16xf32> to vector<16x1xf32>
    %76 = math.log %75 : vector<16x1xf32>
    %77 = vector.broadcast %76 : vector<16x1xf32> to vector<16x128xf32>
    %78 = arith.subf %72, %77 : vector<16x128xf32>
    %cst_23 = arith.constant 0.000000e+00 : f32
    %79 = vector.broadcast %cst_23 : f32 to vector<16x128xf32>
    %80 = arith.cmpf ogt, %15, %79 : vector<16x128xf32>
    %cst_24 = arith.constant 1.000000e+00 : f32
    %81 = vector.broadcast %cst_24 : f32 to vector<16x128xf32>
    %82 = arith.select %80, %15, %81 : vector<16x128xi1>, vector<16x128xf32>
    %cst_25 = arith.constant 0.000000e+00 : f32
    %83 = vector.broadcast %cst_25 : f32 to vector<16x128xf32>
    %84 = arith.cmpf ogt, %15, %83 : vector<16x128xf32>
    %85 = vector.broadcast %21 : vector<16x1xi1> to vector<16x128xi1>
    %86 = arith.andi %85, %84 : vector<16x128xi1>
    %87 = math.log %82 : vector<16x128xf32>
    %88 = arith.subf %87, %78 : vector<16x128xf32>
    %89 = arith.mulf %15, %88 : vector<16x128xf32>
    %cst_26 = arith.constant 0.000000e+00 : f32
    %90 = vector.broadcast %cst_26 : f32 to vector<16x128xf32>
    %91 = arith.select %86, %89, %90 : vector<16x128xi1>, vector<16x128xf32>
    %92 = vector.shape_cast %91 : vector<16x128xf32> to vector<1x16x128xf32>
    %cst_27 = arith.constant dense<0.000000e+00> : vector<1xf32>
    %93 = vector.multi_reduction <add>, %92, %cst_27 [1, 2] : vector<1x16x128xf32> to vector<1xf32>
    %94 = vector.shape_cast %93 : vector<1xf32> to vector<1x1x1xf32>
    %95 = vector.extract %94[0, 0, 0] : f32 from vector<1x1x1xf32>
    %cst_28 = arith.constant 5.000000e-01 : f32
    %96 = arith.mulf %95, %cst_28 : f32
    %c0_29 = arith.constant 0 : index
    %c0_30 = arith.constant 0 : index
    %97 = memref.load %arg5[%c0_29, %c0_30] : memref<1x1xf32, #tpu.memory_space<smem>>
    memref.store %96, %arg5[%c0_29, %c0_30] : memref<1x1xf32, #tpu.memory_space<smem>>
    return
  }
  func.func @transform_0(%arg0: i32) -> (i32, i32) {
    %c0_i32 = arith.constant 0 : i32
    %c0_i32_0 = arith.constant 0 : i32
    return %arg0, %c0_i32 : i32, i32
  }
  func.func @transform_1(%arg0: i32) -> (i32, i32) {
    %c0_i32 = arith.constant 0 : i32
    %c0_i32_0 = arith.constant 0 : i32
    return %arg0, %c0_i32 : i32, i32
  }
  func.func @transform_2(%arg0: i32) -> (i32, i32) {
    %c0_i32 = arith.constant 0 : i32
    %c0_i32_0 = arith.constant 0 : i32
    %c0_i32_1 = arith.constant 0 : i32
    return %c0_i32, %c0_i32_0 : i32, i32
  }
  func.func @transform_3(%arg0: i32) -> (i32, i32) {
    %c0_i32 = arith.constant 0 : i32
    %c0_i32_0 = arith.constant 0 : i32
    %c0_i32_1 = arith.constant 0 : i32
    return %c0_i32, %c0_i32_0 : i32, i32
  }
  func.func @transform_4(%arg0: i32) -> (i32, i32) {
    %c0_i32 = arith.constant 0 : i32
    %c0_i32_0 = arith.constant 0 : i32
    return %arg0, %c0_i32 : i32, i32
  }
}

</mosaic_0001>

<bundles_post_ra>
// kernel: vat_loss.1
= control target key start
LH: loop header
LB: loop body
LE: loop exit
PB: predicated region body
PF: predicated region fallthrough
CT: control target
= control target key end

     0   :  { %s2653_s0 = inlined_call_operand.vmem [shape: bf16[16,1024], index: 0, kind: input, shape index: {}]   ;;  %s2654_s1 = inlined_call_operand.vmem [shape: bf16[16,1024], index: 1, kind: input, shape index: {}]   ;;  %s2655_s2 = inlined_call_operand.vmem [shape: bf16[1024,128], index: 2, kind: input, shape index: {}]   ;;  %s2656_s3 = inlined_call_operand.vmem [shape: f32[1,128], index: 3, kind: input, shape index: {}]   ;;  %s2657_s4 = inlined_call_operand.hbm [shape: f32[1,1], index: 4, kind: output, shape index: {}]  }
   0x1   :  { %v1813_v0 = vld [vmem:[%s2655_s2 + $0xb8] sm:$0xff]  ;;  %v1835_v4 = vld [vmem:[%s2655_s2 + $0xb0] sm:$0xff]  ;;  %v721_v8 = vld [vmem:[%s2654_s1] sm:$0xff] }
   0x2   :  { %v1818_v1 = vld [vmem:[%s2655_s2 + $0x38] sm:$0xff]  ;;  %610 = vmatpush.bf16.msra.mxu2 %v1813_v0  ;;  %v1840_v5 = vld [vmem:[%s2655_s2 + $0x30] sm:$0xff]  ;;  %v722_v9 = vld [vmem:[%s2654_s1 + $0x8] sm:$0xff]  ;;  %v1875_v13 = vunpack.c.l.bf16 %v721_v8  ;;  %v1877_v14 = vunpack.c.h.bf16 %v721_v8 }
   0x3   :  { %v1823_v2 = vld [vmem:[%s2655_s2 + $0xf8] sm:$0xff]  ;;  %582 = vmatpush.bf16.msra.mxu0 %v1818_v1  ;;  %v1847_v6 = vld [vmem:[%s2655_s2 + $0xf0] sm:$0xff]  ;;  %v1868_v11 = vld [vmem:[%s2655_s2 + $0xa8] sm:$0xff]  ;;  %v1879_v15 = vunpack.c.l.bf16 %v722_v9  ;;  %v1881_v16 = vunpack.c.h.bf16 %v722_v9 }
   0x4   :  { %v1828_v3 = vld [vmem:[%s2655_s2 + $0x78] sm:$0xff]  ;;  %624 = vmatpush.bf16.msra.mxu3 %v1823_v2  ;;  %v1852_v7 = vld [vmem:[%s2655_s2 + $0x70] sm:$0xff]  ;;  %v1873_v12 = vld [vmem:[%s2655_s2 + $0x28] sm:$0xff]  ;;  %2726 = vst [vmem:[#allocation5_spill] sm:$0xff] %v1875_v13  ;;  %v745_v21 = vmul.f32 %v1875_v13, %v1875_v13  ;;  %v746_v22 = vmul.f32 %v1877_v14, %v1877_v14 }
   0x5   :  { %596 = vmatpush.bf16.msra.mxu1 %v1828_v3  ;;  %v723_v10 = vld [vmem:[%s2654_s1 + $0x10] sm:$0xff]  ;;  %2727 = vst [vmem:[#allocation6_spill] sm:$0xff] %v1877_v14  ;;  %v1888_v17 = vld [vmem:[%s2655_s2 + $0xe8] sm:$0xff]  ;;  %v724_v19 = vld [vmem:[%s2654_s1 + $0x18] sm:$0xff]  ;;  %v747_v23 = vmul.f32 %v1879_v15, %v1879_v15  ;;  %v748_v25 = vmul.f32 %v1881_v16, %v1881_v16 }
   0x6   :  { %611 = vmatpush.bf16.msra.mxu2 %v1835_v4  ;;  %2728 = vst [vmem:[#allocation7_spill] sm:$0xff] %v1879_v15  ;;  %v1893_v18 = vld [vmem:[%s2655_s2 + $0x68] sm:$0xff]  ;;  %v1898_v20 = vunpack.c.l.bf16 %v723_v10  ;;  %v1906_v24 = vunpack.c.h.bf16 %v723_v10  ;;  %v725_v26 = vld [vmem:[%s2654_s1 + $0x20] sm:$0xff]  ;;  %v761_v30 = vadd.f32 %v746_v22, %v745_v21  ;;  %v727_v31 = vld [vmem:[%s2654_s1 + $0x30] sm:$0xff]  ;;  %v1944_v36 = vunpack.c.l.bf16 %v724_v19 }
   0x7   :  { %583 = vmatpush.bf16.msra.mxu0 %v1840_v5  ;;  %2729 = vst [vmem:[#allocation8_spill] sm:$0xff] %v1881_v16  ;;  %v726_v27 = vld [vmem:[%s2654_s1 + $0x28] sm:$0xff]  ;;  %v1921_v28 = vld [vmem:[%s2655_s2 + $0xa0] sm:$0xff]  ;;  %v1931_v32 = vunpack.c.l.bf16 %v725_v26  ;;  %v1933_v33 = vunpack.c.h.bf16 %v725_v26  ;;  %v1959_v43 = vunpack.c.l.bf16 %v727_v31  ;;  %v1965_v45 = vunpack.c.h.bf16 %v724_v19  ;;  %v1972_v48 = vld [vmem:[%s2655_s2 + $0x98] sm:$0xff] }
   0x8   :  { %625 = vmatpush.bf16.msra.mxu3 %v1847_v6  ;;  %2730 = vst [vmem:[#allocation9_spill] sm:$0xff] %v1898_v20  ;;  %v1926_v29 = vld [vmem:[%s2655_s2 + $0x20] sm:$0xff]  ;;  %v1935_v34 = vunpack.c.l.bf16 %v726_v27  ;;  %v1951_v38 = vunpack.c.h.bf16 %v726_v27  ;;  %v749_v39 = vmul.f32 %v1898_v20, %v1898_v20  ;;  %v762_v40 = vadd.f32 %v761_v30, %v747_v23  ;;  %v1977_v49 = vld [vmem:[%s2655_s2 + $0x18] sm:$0xff]  ;;  %v2011_v63 = vld [vmem:[%s2655_s2 + $0x90] sm:$0xff] }
   0x9   :  { %597 = vmatpush.bf16.msra.mxu1 %v1852_v7  ;;  %2731 = vst [vmem:[#allocation10_spill] sm:$0xff] %v1906_v24  ;;  %v1942_v35 = vld [vmem:[%s2655_s2 + $0xe0] sm:$0xff]  ;;  %v753_v41 = vmul.f32 %v1931_v32, %v1931_v32  ;;  %v754_v42 = vmul.f32 %v1933_v33, %v1933_v33  ;;  %v750_v46 = vmul.f32 %v1906_v24, %v1906_v24  ;;  %v728_v50 = vld [vmem:[%s2654_s1 + $0x38] sm:$0xff]  ;;  %v1994_v53 = vunpack.c.h.bf16 %v727_v31  ;;  %v2016_v8 = vld [vmem:[%s2655_s2 + $0x10] sm:$0xff] }
   0xa   :  { %612 = vmatpush.bf16.msra.mxu2 %v1868_v11  ;;  %2732 = vst [vmem:[#allocation11_spill] sm:$0xff] %v1931_v32  ;;  %v1949_v37 = vld [vmem:[%s2655_s2 + $0x60] sm:$0xff]  ;;  %v755_v44 = vmul.f32 %v1935_v34, %v1935_v34  ;;  %v763_v47 = vadd.f32 %v762_v40, %v748_v25  ;;  %v1987_v51 = vld [vmem:[%s2655_s2 + $0xd8] sm:$0xff]  ;;  %v756_v54 = vmul.f32 %v1951_v38, %v1951_v38  ;;  %v2000_v58 = vunpack.c.l.bf16 %v728_v50  ;;  %v2023_v9 = vld [vmem:[%s2655_s2 + $0xd0] sm:$0xff] }
   0xb   :  { %584 = vmatpush.bf16.msra.mxu0 %v1873_v12  ;;  %2733 = vst [vmem:[#allocation12_spill] sm:$0xff] %v1933_v33  ;;  %v1992_v52 = vld [vmem:[%s2655_s2 + $0x58] sm:$0xff]  ;;  %v770_v55 = vadd.f32 %v754_v42, %v753_v41  ;;  %v751_v56 = vmul.f32 %v1944_v36, %v1944_v36  ;;  %v757_v59 = vmul.f32 %v1959_v43, %v1959_v43  ;;  %v2030_v21 = vld [vmem:[%s2655_s2 + $0x50] sm:$0xff]  ;;  %v2032_v23 = vunpack.c.h.bf16 %v728_v50  ;;  %v2041_v30 = vld [vmem:[%s2655_s2 + $0x88] sm:$0xff] }
   0xc   :  { %2734 = vst [vmem:[#allocation13_spill] sm:$0xff] %v1935_v34  ;;  %626 = vmatpush.bf16.msra.mxu3 %v1888_v17  ;;  %v764_v57 = vadd.f32 %v763_v47, %v749_v39  ;;  %v752_v61 = vmul.f32 %v1965_v45, %v1965_v45  ;;  %v758_v10 = vmul.f32 %v1994_v53, %v1994_v53  ;;  %v2046_v31 = vld [vmem:[%s2655_s2 + $0x8] sm:$0xff] }
   0xd   :  { %598 = vmatpush.bf16.msra.mxu1 %v1893_v18  ;;  %2735 = vst [vmem:[#allocation14_spill] sm:$0xff] %v1944_v36  ;;  %v771_v60 = vadd.f32 %v770_v55, %v755_v44  ;;  %v759_v25 = vmul.f32 %v2000_v58, %v2000_v58  ;;  %v2053_v40 = vld [vmem:[%s2655_s2 + $0xc8] sm:$0xff]  ;;  %v760_v42 = vmul.f32 %v2032_v23, %v2032_v23 }
   0xe   :  { %2736 = vst [vmem:[#allocation15_spill] sm:$0xff] %v1951_v38  ;;  %613 = vmatpush.bf16.msra.mxu2 %v1921_v28  ;;  %v765_v62 = vadd.f32 %v764_v57, %v750_v46  ;;  %v2058_v41 = vld [vmem:[%s2655_s2 + $0x48] sm:$0xff]  ;;  %v2065_v46 = vld [vmem:[%s2655_s2 + $0x80] sm:$0xff] }
   0xf   :  { %2737 = vst [vmem:[#allocation16_spill] sm:$0xff] %v1959_v43  ;;  %585 = vmatpush.bf16.msra.mxu0 %v1926_v29  ;;  %v772_v19 = vadd.f32 %v771_v60, %v756_v54 }
  0x10   :  { %2738 = vst [vmem:[#allocation17_spill] sm:$0xff] %v1965_v45  ;;  %627 = vmatpush.bf16.msra.mxu3 %v1942_v35  ;;  %v766_v22 = vadd.f32 %v765_v62, %v751_v56 }
  0x11   :  { %599 = vmatpush.bf16.msra.mxu1 %v1949_v37  ;;  %2739 = vst [vmem:[#allocation18_spill] sm:$0xff] %v1994_v53  ;;  %v773_v26 = vadd.f32 %v772_v19, %v757_v59 }
  0x12   :  { %2740 = vst [vmem:[#allocation19_spill] sm:$0xff] %v2000_v58  ;;  %614 = vmatpush.bf16.msra.mxu2 %v1972_v48  ;;  %v767_v27 = vadd.f32 %v766_v22, %v752_v61 }
  0x13   :  { %586 = vmatpush.bf16.msra.mxu0 %v1977_v49  ;;  %2741 = vst [vmem:[#allocation20_spill] sm:$0xff] %v2032_v23  ;;  %v774_v39 = vadd.f32 %v773_v26, %v758_v10 }
  0x14   :  { %628 = vmatpush.bf16.msra.mxu3 %v1987_v51  ;;  %768 = vadd.xlane.f32.xlu0 %v767_v27 }
  0x15   :  { %600 = vmatpush.bf16.msra.mxu1 %v1992_v52  ;;  %v775_v44 = vadd.f32 %v774_v39, %v759_v25 }
  0x16   :  { %615 = vmatpush.bf16.msra.mxu2 %v2011_v63 }
  0x17   :  { %587 = vmatpush.bf16.msra.mxu0 %v2016_v8 }
  0x18   :  { %629 = vmatpush.bf16.msra.mxu3 %v2023_v9 }
  0x19   :  { %601 = vmatpush.bf16.msra.mxu1 %v2030_v21 }
  0x1a   :  { %9 = vsyncpa [#allocation3], 0  ;;  %616 = vmatpush.bf16.msra.mxu2 %v2041_v30  ;;  %v2072_v47 = vld [vmem:[%s2655_s2 + $0x1b8] sm:$0xff]  ;;  %v2077_v50 = vld [vmem:[%s2655_s2] sm:$0xff]  ;;  %v776_v59 = vadd.f32 %v775_v44, %v760_v42  ;;  %vm1783_vm5 = vmmov 1   ;;  %s1340_s5 = sshll.u32 %s2657_s4, 4  ;;  %s1341_s5 = int_to_ptr.hbm [resolvable:$true] %s1340_s5 }
  0x1b   :  { %588 = vmatpush.bf16.msra.mxu0 %v2046_v31  ;;  %v2082_v54 = vld [vmem:[%s2655_s2 + $0xc0] sm:$0xff]  ;;  %v2089_v55 = vld [vmem:[%s2655_s2 + $0x138] sm:$0xff]  ;;  %v1360_v56 = vld [vmem:[%s2653_s0 + $0x8] sm:$0xf]  ;;  %s1784_s8 = smov [#allocation2]  }
  0x1c   :  { %630 = vmatpush.bf16.msra.mxu3 %v2053_v40  ;;  %v1731_v57 = vld [vmem:[%s2653_s0 + $0x24] sm:$0xf0]  ;;  %v2100_v60 = vld [vmem:[%s2655_s2 + $0x1f8] sm:$0xff]  ;;  %v1352_v61 = vld [vmem:[%s2653_s0] sm:$0xf]  ;;  %777 = vadd.xlane.f32.xlu0 %v776_v59 }
  0x1d   :  { %602 = vmatpush.bf16.msra.mxu1 %v2058_v41  ;;  %v1730_v62 = vld [vmem:[%s2653_s0 + $0x1c] sm:$0xf0]  ;;  %v1727_v19 = vld [vmem:[%s2653_s0 + $0xc] sm:$0xf]  ;;  %v2124_v25 = vld [vmem:[%s2655_s2 + $0x178] sm:$0xff]  ;;  %v1361_v26 = vor.u32 %v1731_v57, %v1360_v56 }
  0x1e   :  { %v2111_v10 = vld [vmem:[%s2655_s2 + $0x40] sm:$0xff]  ;;  %v1362_v22 = vld [vmem:[%s2653_s0 + $0x28] sm:$0xf0]  ;;  %617 = vmatpush.bf16.msra.mxu2 %v2065_v46  ;;  %v2137_v42 = vld [vmem:[%s2655_s2 + $0x1b0] sm:$0xff]  ;;  %v1353_v44 = vor.u32 %v1730_v62, %v1352_v61 }
  0x1f   :  { %589 = vmatpush.bf16.msra.mxu0 %v2077_v50  ;;  %v1726_v27 = vld [vmem:[%s2653_s0 + $0x4] sm:$0xf]  ;;  %2742 = vst [vmem:[#allocation21_spill] sm:$0xff] %v2137_v42  ;;  %v2143_v56 = vld [vmem:[%s2655_s2 + $0x130] sm:$0xff]  ;;  %v1365_v57 = vor.u32 %v1727_v19, %v1362_v22  ;;  %v2162_v61 = vld [vmem:[%s2655_s2 + $0x1a8] sm:$0xff] }
  0x20   :  { %v1354_v39 = vld [vmem:[%s2653_s0 + $0x20] sm:$0xf0]  ;;  %631 = vmatpush.bf16.msra.mxu3 %v2082_v54  ;;  %v2150_v45 = vld [vmem:[%s2655_s2 + $0x1f0] sm:$0xff]  ;;  %2744 = vst [vmem:[#allocation23_spill] sm:$0xff] %v2162_v61  ;;  %v2168_v62 = vld [vmem:[%s2655_s2 + $0x128] sm:$0xff] }
  0x21   :  { %603 = vmatpush.bf16.msra.mxu1 %v2111_v10  ;;  %2743 = vst [vmem:[#allocation22_spill] sm:$0xff] %v2150_v45  ;;  %v1357_v36 = vor.u32 %v1726_v27, %v1354_v39  ;;  %v2156_v59 = vld [vmem:[%s2655_s2 + $0x170] sm:$0xff]  ;;  %618 = vmatmul.bf16.vlgmr.msra.gmra.mxu2 %v1361_v26  ;;  %v2174_v19 = vld [vmem:[%s2655_s2 + $0x1e8] sm:$0xff]  ;;  %v2186_v26 = vld [vmem:[%s2655_s2 + $0x1a0] sm:$0xff] }
  0x22   :  { %666 = vmatpush.bf16.msrb.mxu2 %v2072_v47  ;;  %590 = vmatmul.bf16.vlgmr.msra.gmra.mxu0 %v1353_v44  ;;  %2745 = vst [vmem:[#allocation24_spill] sm:$0xff] %v2168_v62  ;;  %v2180_v22 = vld [vmem:[%s2655_s2 + $0x168] sm:$0xff]  ;;  %v2198_v27 = vld [vmem:[%s2655_s2 + $0x1e0] sm:$0xff]  ;;  %v2210_v44 = vld [vmem:[%s2655_s2 + $0x198] sm:$0xff] }
  0x23   :  { %638 = vmatpush.bf16.msrb.mxu0 %v2089_v55  ;;  %632 = vmatmul.bf16.vlgmr.msra.gmra.mxu3 %v1365_v57  ;;  %2746 = vst [vmem:[#allocation25_spill] sm:$0xff] %v2174_v19  ;;  %v2204_v39 = vld [vmem:[%s2655_s2 + $0x160] sm:$0xff]  ;;  %v2216_v57 = vld [vmem:[%s2655_s2 + $0x118] sm:$0xff]  ;;  %v2234_v23 = vld [vmem:[%s2655_s2 + $0x190] sm:$0xff] }
  0x24   :  { %680 = vmatpush.bf16.msrb.mxu3 %v2100_v60  ;;  %604 = vmatmul.bf16.vlgmr.msra.gmra.mxu1 %v1357_v36  ;;  %2747 = vst [vmem:[#allocation26_spill] sm:$0xff] %v2180_v22  ;;  %v2192_v36 = vld [vmem:[%s2655_s2 + $0x120] sm:$0xff]  ;;  %v2222_v24 = vld [vmem:[%s2655_s2 + $0x1d8] sm:$0xff]  ;;  %v2240_v58 = vld [vmem:[%s2655_s2 + $0x110] sm:$0xff] }
  0x25   :  { %652 = vmatpush.bf16.msrb.mxu1 %v2124_v25  ;;  %2748 = vst [vmem:[#allocation27_spill] sm:$0xff] %v2186_v26  ;;  %v2228_v20 = vld [vmem:[%s2655_s2 + $0x158] sm:$0xff]  ;;  %v2246_v53 = vld [vmem:[%s2655_s2 + $0x1d0] sm:$0xff]  ;;  %v2258_v38 = vld [vmem:[%s2655_s2 + $0x188] sm:$0xff] }
  0x26   :  { %667 = vmatpush.bf16.msrb.mxu2 %v2137_v42  ;;  %2749 = vst [vmem:[#allocation28_spill] sm:$0xff] %v2192_v36  ;;  %v2252_v43 = vld [vmem:[%s2655_s2 + $0x150] sm:$0xff]  ;;  %v2264_v34 = vld [vmem:[%s2655_s2 + $0x108] sm:$0xff]  ;;  %v2282_v16 = vld [vmem:[%s2655_s2 + $0x180] sm:$0xff] }
  0x27   :  { %639 = vmatpush.bf16.msrb.mxu0 %v2143_v56  ;;  %2750 = vst [vmem:[#allocation29_spill] sm:$0xff] %v2198_v27  ;;  %v2270_v33 = vld [vmem:[%s2655_s2 + $0x1c8] sm:$0xff]  ;;  %v1376_v15 = vld [vmem:[%s2653_s0 + $0x18] sm:$0xf]  ;;  %v2294_v13 = vld [vmem:[%s2655_s2 + $0x100] sm:$0xff] }
  0x28   :  { %681 = vmatpush.bf16.msrb.mxu3 %v2150_v45  ;;  %2751 = vst [vmem:[#allocation30_spill] sm:$0xff] %v2204_v39  ;;  %v2276_v32 = vld [vmem:[%s2655_s2 + $0x148] sm:$0xff]  ;;  %v1733_v14 = vld [vmem:[%s2653_s0 + $0x34] sm:$0xf0] }
  0x29   :  { %653 = vmatpush.bf16.msrb.mxu1 %v2156_v59  ;;  %2752 = vst [vmem:[#allocation31_spill] sm:$0xff] %v2210_v44 }
  0x2a   :  { %668 = vmatpush.bf16.msrb.mxu2 %v2162_v61  ;;  %2753 = vst [vmem:[#allocation32_spill] sm:$0xff] %v2216_v57 }
  0x2b   :  { %640 = vmatpush.bf16.msrb.mxu0 %v2168_v62  ;;  %2754 = vst [vmem:[#allocation33_spill] sm:$0xff] %v2222_v24 }
  0x2c   :  { %682 = vmatpush.bf16.msrb.mxu3 %v2174_v19  ;;  %2755 = vst [vmem:[#allocation34_spill] sm:$0xff] %v2228_v20 }
  0x2d   :  { %654 = vmatpush.bf16.msrb.mxu1 %v2180_v22  ;;  %2756 = vst [vmem:[#allocation35_spill] sm:$0xff] %v2234_v23 }
  0x2e   :  { %669 = vmatpush.bf16.msrb.mxu2 %v2186_v26  ;;  %2757 = vst [vmem:[#allocation36_spill] sm:$0xff] %v2240_v58 }
  0x2f   :  { %641 = vmatpush.bf16.msrb.mxu0 %v2192_v36  ;;  %2758 = vst [vmem:[#allocation37_spill] sm:$0xff] %v2246_v53 }
  0x30   :  { %683 = vmatpush.bf16.msrb.mxu3 %v2198_v27  ;;  %2759 = vst [vmem:[#allocation38_spill] sm:$0xff] %v2252_v43 }
  0x31   :  { %655 = vmatpush.bf16.msrb.mxu1 %v2204_v39  ;;  %2760 = vst [vmem:[#allocation39_spill] sm:$0xff] %v2258_v38 }
  0x32   :  { %670 = vmatpush.bf16.msrb.mxu2 %v2210_v44  ;;  %2761 = vst [vmem:[#allocation40_spill] sm:$0xff] %v2264_v34 }
  0x33   :  { %642 = vmatpush.bf16.msrb.mxu0 %v2216_v57  ;;  %2762 = vst [vmem:[#allocation41_spill] sm:$0xff] %v2270_v33 }
  0x34   :  { %684 = vmatpush.bf16.msrb.mxu3 %v2222_v24  ;;  %2763 = vst [vmem:[#allocation42_spill] sm:$0xff] %v2276_v32  ;;  %v1377_v24 = vor.u32 %v1733_v14, %v1376_v15  ;;  %v2768_v15 = vld [vmem:[#allocation32_spill] sm:$0xff] }
  0x35   :  { %656 = vmatpush.bf16.msrb.mxu1 %v2228_v20  ;;  %2764 = vst [vmem:[#allocation43_spill] sm:$0xff] %v2282_v16  ;;  %v1370_v20 = vld [vmem:[%s2653_s0 + $0x30] sm:$0xf0] }
  0x36   :  { %671 = vmatpush.bf16.msrb.mxu2 %v2234_v23  ;;  %2765 = vst [vmem:[#allocation44_spill] sm:$0xff] %v2294_v13  ;;  %v1728_v23 = vld [vmem:[%s2653_s0 + $0x14] sm:$0xf] }
  0x37   :  { %643 = vmatpush.bf16.msrb.mxu0 %v2240_v58  ;;  %v1378_v58 = vld [vmem:[%s2653_s0 + $0x38] sm:$0xf0]  ;;  %v1373_v14 = vor.u32 %v1728_v23, %v1370_v20  ;;  %v2769_v20 = vld [vmem:[#allocation34_spill] sm:$0xff] }
  0x38   :  { %685 = vmatpush.bf16.msrb.mxu3 %v2246_v53  ;;  %v1368_v53 = vld [vmem:[%s2653_s0 + $0x10] sm:$0xf] }
  0x39   :  { %657 = vmatpush.bf16.msrb.mxu1 %v2252_v43  ;;  %v2306_v43 = vld [vmem:[%s2655_s2 + $0x1c0] sm:$0xff]  ;;  %v2776_v23 = vld [vmem:[#allocation40_spill] sm:$0xff] }
  0x3a   :  { %672 = vmatpush.bf16.msrb.mxu2 %v2258_v38  ;;  %v1732_v38 = vld [vmem:[%s2653_s0 + $0x2c] sm:$0xf0]  ;;  %2766 = vst [vmem:[#allocation45_spill] sm:$0xff] %v2306_v43 }
  0x3b   :  { %644 = vmatpush.bf16.msrb.mxu0 %v2264_v34  ;;  %v1729_v34 = vld [vmem:[%s2653_s0 + $0x1c] sm:$0xf]  ;;  %v1369_v57 = vor.u32 %v1732_v38, %v1368_v53  ;;  %v2773_v38 = vld [vmem:[#allocation38_spill] sm:$0xff]  ;;  %v2774_v53 = vld [vmem:[#allocation39_spill] sm:$0xff] }
  0x3c   :  { %686 = vmatpush.bf16.msrb.mxu3 %v2270_v33  ;;  %v2318_v33 = vld [vmem:[%s2655_s2 + $0x140] sm:$0xff] }
  0x3d   :  { %658 = vmatpush.bf16.msrb.mxu1 %v2276_v32  ;;  %2767 = vst [vmem:[#allocation46_spill] sm:$0xff] %v2318_v33  ;;  %v1381_v32 = vor.u32 %v1729_v34, %v1378_v58  ;;  %v2772_v34 = vld [vmem:[#allocation36_spill] sm:$0xff]  ;;  %v2775_v58 = vld [vmem:[#allocation37_spill] sm:$0xff] }
  0x3e   :  { %673 = vmatpush.bf16.msrb.mxu2 %v2282_v16 }
  0x3f   :  { %645 = vmatpush.bf16.msrb.mxu0 %v2294_v13 }
  0x40   :  { %687 = vmatpush.bf16.msrb.mxu3 %v2306_v43 }
  0x41   :  { %674 = vmatmul.bf16.vlgmr.msrb.gmra.mxu2 %v1377_v24  ;;  %659 = vmatpush.bf16.msrb.mxu1 %v2318_v33  ;;  %v2770_v24 = vld [vmem:[#allocation35_spill] sm:$0xff] }
  0x42   :  { %859 = vmatpush.bf16.msra.mxu2 %v1813_v0  ;;  %646 = vmatmul.bf16.vlgmr.msrb.gmra.mxu0 %v1369_v57  ;;  %v2777_v57 = vld [vmem:[#allocation42_spill] sm:$0xff] }
  0x43   :  { %831 = vmatpush.bf16.msra.mxu0 %v1818_v1  ;;  %688 = vmatmul.bf16.vlgmr.msrb.gmra.mxu3 %v1381_v32  ;;  %v2771_v32 = vld [vmem:[#allocation33_spill] sm:$0xff] }
  0x44   :  { %660 = vmatmul.bf16.vlgmr.msrb.gmra.mxu1 %v1373_v14  ;;  %873 = vmatpush.bf16.msra.mxu3 %v1823_v2  ;;  %v2778_v14 = vld [vmem:[#allocation41_spill] sm:$0xff] }
  0x45   :  { %845 = vmatpush.bf16.msra.mxu1 %v1828_v3 }
  0x46   :  { %860 = vmatpush.bf16.msra.mxu2 %v1835_v4 }
  0x47   :  { %832 = vmatpush.bf16.msra.mxu0 %v1840_v5 }
  0x48   :  { %874 = vmatpush.bf16.msra.mxu3 %v1847_v6 }
  0x49   :  { %846 = vmatpush.bf16.msra.mxu1 %v1852_v7 }
  0x4a   :  { %861 = vmatpush.bf16.msra.mxu2 %v1868_v11 }
  0x4b   :  { %833 = vmatpush.bf16.msra.mxu0 %v1873_v12 }
  0x4c   :  { %875 = vmatpush.bf16.msra.mxu3 %v1888_v17 }
  0x4d   :  { %847 = vmatpush.bf16.msra.mxu1 %v1893_v18 }
  0x4e   :  { %862 = vmatpush.bf16.msra.mxu2 %v1921_v28 }
  0x4f   :  { %834 = vmatpush.bf16.msra.mxu0 %v1926_v29 }
  0x50   :  { %876 = vmatpush.bf16.msra.mxu3 %v1942_v35 }
  0x51   :  { %848 = vmatpush.bf16.msra.mxu1 %v1949_v37 }
  0x52   :  { %863 = vmatpush.bf16.msra.mxu2 %v1972_v48 }
  0x53   :  { %835 = vmatpush.bf16.msra.mxu0 %v1977_v49 }
  0x54   :  { %877 = vmatpush.bf16.msra.mxu3 %v1987_v51 }
  0x55   :  { %849 = vmatpush.bf16.msra.mxu1 %v1992_v52 }
  0x56   :  { %864 = vmatpush.bf16.msra.mxu2 %v2011_v63 }
  0x57   :  { %836 = vmatpush.bf16.msra.mxu0 %v2016_v8 }
  0x58   :  { %878 = vmatpush.bf16.msra.mxu3 %v2023_v9 }
  0x59   :  { %850 = vmatpush.bf16.msra.mxu1 %v2030_v21 }
  0x5a   :  { %865 = vmatpush.bf16.msra.mxu2 %v2041_v30 }
  0x5b   :  { %837 = vmatpush.bf16.msra.mxu0 %v2046_v31 }
  0x5c   :  { %879 = vmatpush.bf16.msra.mxu3 %v2053_v40 }
  0x5d   :  { %851 = vmatpush.bf16.msra.mxu1 %v2058_v41 }
  0x5e   :  { %866 = vmatpush.bf16.msra.mxu2 %v2065_v46 }
  0x5f   :  { %838 = vmatpush.bf16.msra.mxu0 %v2077_v50 }
  0x60   :  { %880 = vmatpush.bf16.msra.mxu3 %v2082_v54 }
  0x61   :  { %852 = vmatpush.bf16.msra.mxu1 %v2111_v10 }
  0x62   :  { %915 = vmatpush.bf16.msrb.mxu2 %v2072_v47 }
  0x63   :  { %887 = vmatpush.bf16.msrb.mxu0 %v2089_v55 }
  0x64   :  { %929 = vmatpush.bf16.msrb.mxu3 %v2100_v60 }
  0x65   :  { %901 = vmatpush.bf16.msrb.mxu1 %v2124_v25 }
  0x66   :  { %916 = vmatpush.bf16.msrb.mxu2 %v2137_v42 }
  0x67   :  { %888 = vmatpush.bf16.msrb.mxu0 %v2143_v56 }
  0x68   :  { %930 = vmatpush.bf16.msrb.mxu3 %v2150_v45 }
  0x69   :  { %902 = vmatpush.bf16.msrb.mxu1 %v2156_v59 }
  0x6a   :  { %917 = vmatpush.bf16.msrb.mxu2 %v2162_v61 }
  0x6b   :  { %889 = vmatpush.bf16.msrb.mxu0 %v2168_v62  ;;  %v2783_v62 = vld [vmem:[#allocation11_spill] sm:$0xff] }
  0x6c   :  { %931 = vmatpush.bf16.msrb.mxu3 %v2174_v19 }
  0x6d   :  { %903 = vmatpush.bf16.msrb.mxu1 %v2180_v22 }
  0x6e   :  { %918 = vmatpush.bf16.msrb.mxu2 %v2186_v26 }
  0x6f   :  { %890 = vmatpush.bf16.msrb.mxu0 %v2192_v36 }
  0x70   :  { %932 = vmatpush.bf16.msrb.mxu3 %v2198_v27 }
  0x71   :  { %904 = vmatpush.bf16.msrb.mxu1 %v2204_v39 }
  0x72   :  { %919 = vmatpush.bf16.msrb.mxu2 %v2210_v44 }
  0x73   :  { %891 = vmatpush.bf16.msrb.mxu0 %v2768_v15 }
  0x74   :  { %933 = vmatpush.bf16.msrb.mxu3 %v2771_v32 }
  0x75   :  { %905 = vmatpush.bf16.msrb.mxu1 %v2769_v20 }
  0x76   :  { %920 = vmatpush.bf16.msrb.mxu2 %v2770_v24 }
  0x77   :  { %892 = vmatpush.bf16.msrb.mxu0 %v2772_v34 }
  0x78   :  { %934 = vmatpush.bf16.msrb.mxu3 %v2775_v58 }
  0x79   :  { %906 = vmatpush.bf16.msrb.mxu1 %v2773_v38 }
  0x7a   :  { %921 = vmatpush.bf16.msrb.mxu2 %v2774_v53 }
  0x7b   :  { %893 = vmatpush.bf16.msrb.mxu0 %v2776_v23 }
  0x7c   :  { %935 = vmatpush.bf16.msrb.mxu3 %v2778_v14 }
  0x7d   :  { %907 = vmatpush.bf16.msrb.mxu1 %v2777_v57 }
  0x7e   :  { %922 = vmatpush.bf16.msrb.mxu2 %v2282_v16 }
  0x7f   :  { %894 = vmatpush.bf16.msrb.mxu0 %v2294_v13 }
  0x80   :  { %936 = vmatpush.bf16.msrb.mxu3 %v2306_v43 }
  0x81   :  { %908 = vmatpush.bf16.msrb.mxu1 %v2318_v33 }
  0x87   :  { %v769_v24 = vpop.xlane.xlu0 %768 }
  0x88   :  { %1739 = vrsqrt.f32 %v769_v24  ;;  %vm786_vm0 = vcmp.eq.f32.partialorder %v769_v24, inf  ;;  %v789_v15 = vand.u32 2147483648, %v769_v24  ;;  %vm788_vm1 = vcmp.eq.f32.partialorder %v769_v24, 0.0 }
  0x8e   :  { %v1740_v38 = vpop.eup %1739 }
  0x8f   :  { %v780_v53 = vmul.f32 %v1740_v38, %v769_v24  ;;  %v778_v34 = vpop.xlane.xlu0 %777 }
  0x90   :  { %1741 = vrsqrt.f32 %v778_v34  ;;  %vm798_vm2 = vcmp.eq.f32.partialorder %v778_v34, inf  ;;  %vm800_vm3 = vcmp.eq.f32.partialorder %v778_v34, 0.0 }
  0x91   :  { %v781_v58 = vmul.f32 %v1740_v38, %v780_v53 }
  0x93   :  { %v782_v23 = vmul.f32 0.5, %v781_v58  ;;  %v801_v58 = vand.u32 2147483648, %v778_v34 }
  0x95   :  { %v783_v32 = vsub.f32 1.5, %v782_v23 }
  0x96   :  { %v1742_v57 = vpop.eup %1741 }
  0x97   :  { %v784_v44 = vmul.f32 %v1740_v38, %v783_v32  ;;  %v792_v16 = vmul.f32 %v1742_v57, %v778_v34 }
  0x99   :  { %v785_v20 = vmul.f32 %v784_v44, %v769_v24  ;;  %v793_v14 = vmul.f32 %v1742_v57, %v792_v16  ;;  %v1738_v44 = vld [vmem:[%s2656_s3] ss:$0 sm:$0xff] }
  0x9b   :  { %v787_v13 = vsel %vm786_vm0, %v769_v24, %v785_v20  ;;  %v794_v33 = vmul.f32 0.5, %v793_v14 }
  0x9c   :  { %v790_v27 = vsel %vm788_vm1, %v789_v15, %v787_v13 }
  0x9d   :  { %v795_v26 = vsub.f32 1.5, %v794_v33  ;;  %v803_v19 = vadd.f32 1e-08, %v790_v27 }
  0x9f   :  { %v591_v43 = vpop.f32.mrf.mxu0  ;;  %v796_v36 = vmul.f32 %v1742_v57, %v795_v26  ;;  %1743 = vrcp.f32 %v803_v19  ;;  %v2779_v57 = vld [vmem:[#allocation5_spill] sm:$0xff]  ;;  %v2781_v19 = vld [vmem:[#allocation7_spill] sm:$0xff] }
  0xa0   :  { %v592_v33 = vadd.f32 %v1738_v44, %v591_v43  ;;  %v2786_v43 = vld [vmem:[#allocation15_spill] sm:$0xff] }
  0xa1   :  { %v605_v39 = vpop.f32.mrf.mxu1  ;;  %v797_v61 = vmul.f32 %v796_v36, %v778_v34 }
  0xa2   :  { %v606_v15 = vadd.f32 %v605_v39, %v592_v33 }
  0xa3   :  { %v799_v23 = vsel %vm798_vm2, %v778_v34, %v797_v61  ;;  %v2780_v34 = vld [vmem:[#allocation6_spill] sm:$0xff] }
  0xa4   :  { %v619_v53 = vpop.f32.mrf.mxu2  ;;  %v802_v16 = vsel %vm800_vm3, %v801_v58, %v799_v23  ;;  %v2782_v23 = vld [vmem:[#allocation8_spill] sm:$0xff] }
  0xa5   :  { %v804_v24 = vadd.f32 1e-08, %v802_v16  ;;  %v1744_v27 = vpop.eup %1743  ;;  %v620_v42 = vadd.f32 %v619_v53, %v606_v15  ;;  %v2788_v53 = vld [vmem:[#allocation18_spill] sm:$0xff] }
  0xa6   :  { %v633_v32 = vpop.f32.mrf.mxu3  ;;  %v807_v61 = vmul.f32 %v1744_v27, %v2779_v57  ;;  %v808_v14 = vmul.f32 %v1744_v27, %v2780_v34  ;;  %v809_v58 = vmul.f32 %v1744_v27, %v2781_v19  ;;  %v810_v22 = vmul.f32 %v1744_v27, %v2782_v23  ;;  %v2789_v19 = vld [vmem:[#allocation19_spill] sm:$0xff]  ;;  %v2790_v23 = vld [vmem:[#allocation20_spill] sm:$0xff] }
  0xa7   :  { %v593_v20 = vpop.f32.mrf.mxu0  ;;  %1745 = vrcp.f32 %v804_v24 }
  0xa8   :  { %v2784_v20 = vld [vmem:[#allocation12_spill] sm:$0xff] }
  0xa9   :  { %v607_v13 = vpop.f32.mrf.mxu1 }
  0xaa   :  { %v2785_v13 = vld [vmem:[#allocation13_spill] sm:$0xff] }
  0xac   :  { %v621_v26 = vpop.f32.mrf.mxu2 }
  0xad   :  { %v1746_v38 = vpop.eup %1745 }
  0xae   :  { %v635_v36 = vpop.f32.mrf.mxu3  ;;  %v815_v45 = vmul.f32 %v1746_v38, %v2783_v62  ;;  %v816_v16 = vmul.f32 %v1746_v38, %v2784_v20  ;;  %v817_v24 = vmul.f32 %v1746_v38, %v2785_v13  ;;  %v818_v44 = vmul.f32 %v1746_v38, %v2786_v43  ;;  %v2791_v20 = vld [vmem:[#allocation9_spill] sm:$0xff]  ;;  %v2792_v13 = vld [vmem:[#allocation10_spill] sm:$0xff] }
  0xaf   :  { %v634_v62 = vadd.f32 %v633_v32, %v620_v42  ;;  %v820_v15 = vmul.f32 %v1746_v38, %v2788_v53  ;;  %v822_v42 = vmul.f32 %v1746_v38, %v2790_v23  ;;  %v2799_v23 = vld [vmem:[#allocation23_spill] sm:$0xff] }
  0xb0   :  { %v823_v26 = vpack.c.bf16 %v815_v45, %v807_v61  ;;  %v824_v36 = vpack.c.bf16 %v816_v16, %v808_v14  ;;  %v825_v39 = vpack.c.bf16 %v817_v24, %v809_v58  ;;  %v826_v33 = vpack.c.bf16 %v818_v44, %v810_v22  ;;  %v2787_v14 = vld [vmem:[#allocation16_spill] sm:$0xff]  ;;  %v2793_v44 = vld [vmem:[#allocation14_spill] sm:$0xff] }
  0xb1   :  { %v819_v22 = vmul.f32 %v1746_v38, %v2787_v14  ;;  %v821_v58 = vmul.f32 %v1746_v38, %v2789_v19  ;;  %v811_v16 = vmul.f32 %v1744_v27, %v2791_v20  ;;  %v812_v24 = vmul.f32 %v1744_v27, %v2792_v13  ;;  %v2797_v19 = vld [vmem:[#allocation24_spill] sm:$0xff]  ;;  %v2802_v20 = vld [vmem:[#allocation30_spill] sm:$0xff]  ;;  %v2804_v13 = vld [vmem:[#allocation29_spill] sm:$0xff] }
  0xb2   :  { %839 = vmatmul.bf16.vlgmr.msra.gmra.mxu0 %v823_v26  ;;  %853 = vmatmul.bf16.vlgmr.msra.gmra.mxu1 %v824_v36  ;;  %v813_v26 = vmul.f32 %v1744_v27, %v2793_v44  ;;  %v2794_v36 = vld [vmem:[#allocation17_spill] sm:$0xff]  ;;  %v2807_v44 = vld [vmem:[#allocation31_spill] sm:$0xff] }
  0xb3   :  { %867 = vmatmul.bf16.vlgmr.msra.gmra.mxu2 %v825_v39  ;;  %881 = vmatmul.bf16.vlgmr.msra.gmra.mxu3 %v826_v33  ;;  %v814_v39 = vmul.f32 %v1744_v27, %v2794_v36  ;;  %v2809_v36 = vld [vmem:[#allocation36_spill] sm:$0xff] }
  0xb4   :  { %974 = vmatpush.bf16.xpose.msra.mxu0 %v1818_v1  ;;  %988 = vmatpush.bf16.xpose.msra.mxu1 %v1828_v3 }
  0xb5   :  { %1002 = vmatpush.bf16.xpose.msra.mxu2 %v1813_v0  ;;  %1016 = vmatpush.bf16.xpose.msra.mxu3 %v1823_v2  ;;  %v830_v14 = vpack.c.bf16 %v822_v42, %v814_v39  ;;  %v2800_v42 = vld [vmem:[#allocation25_spill] sm:$0xff]  ;;  %v2810_v39 = vld [vmem:[#allocation38_spill] sm:$0xff] }
  0xbc   :  { %975 = vmatpush.bf16.xpose.msra.mxu0 %v1840_v5  ;;  %989 = vmatpush.bf16.xpose.msra.mxu1 %v1852_v7 }
  0xbd   :  { %1003 = vmatpush.bf16.xpose.msra.mxu2 %v1835_v4  ;;  %1017 = vmatpush.bf16.xpose.msra.mxu3 %v1847_v6 }
  0xbf   :  { %v647_v57 = vpop.f32.mrf.mxu0 }
  0xc0   :  { %v648_v34 = vadd.f32 %v647_v57, %v634_v62  ;;  %v827_v62 = vpack.c.bf16 %v819_v22, %v811_v16  ;;  %v828_v57 = vpack.c.bf16 %v820_v15, %v812_v24  ;;  %v2795_v22 = vld [vmem:[#allocation21_spill] sm:$0xff]  ;;  %v2796_v15 = vld [vmem:[#allocation22_spill] sm:$0xff]  ;;  %v2803_v16 = vld [vmem:[#allocation27_spill] sm:$0xff] }
  0xc1   :  { %v661_v45 = vpop.f32.mrf.mxu1  ;;  %v2805_v24 = vld [vmem:[#allocation32_spill] sm:$0xff] }
  0xc2   :  { %v662_v61 = vadd.f32 %v661_v45, %v648_v34  ;;  %v829_v45 = vpack.c.bf16 %v821_v58, %v813_v26  ;;  %895 = vmatmul.bf16.vlgmr.msrb.gmra.mxu0 %v827_v62  ;;  %909 = vmatmul.bf16.vlgmr.msrb.gmra.mxu1 %v828_v57  ;;  %v2798_v58 = vld [vmem:[#allocation26_spill] sm:$0xff]  ;;  %v2808_v26 = vld [vmem:[#allocation33_spill] sm:$0xff]  ;;  %v2813_v57 = vld [vmem:[#allocation40_spill] sm:$0xff] }
  0xc3   :  { %937 = vmatmul.bf16.vlgmr.msrb.gmra.mxu3 %v830_v14  ;;  %v2812_v62 = vld [vmem:[#allocation37_spill] sm:$0xff] }
  0xc4   :  { %v675_v32 = vpop.f32.mrf.mxu2  ;;  %923 = vmatmul.bf16.vlgmr.msrb.gmra.mxu2 %v829_v45  ;;  %976 = vmatpush.bf16.xpose.msra.mxu0 %v1873_v12  ;;  %v2815_v45 = vld [vmem:[#allocation39_spill] sm:$0xff]  ;;  %v2816_v14 = vld [vmem:[#allocation41_spill] sm:$0xff] }
  0xc5   :  { %v676_v43 = vadd.f32 %v675_v32, %v662_v61  ;;  %990 = vmatpush.bf16.xpose.msra.mxu1 %v1893_v18  ;;  %1004 = vmatpush.bf16.xpose.msra.mxu2 %v1868_v11  ;;  %v2801_v32 = vld [vmem:[#allocation28_spill] sm:$0xff] }
  0xc6   :  { %v689_v33 = vpop.f32.mrf.mxu3  ;;  %1018 = vmatpush.bf16.xpose.msra.mxu3 %v1888_v17 }
  0xc7   :  { %v2421_v34 = vadd.f32 %v689_v33, %v676_v43  ;;  %v649_v38 = vpop.f32.mrf.mxu0  ;;  %v2806_v43 = vld [vmem:[#allocation34_spill] sm:$0xff]  ;;  %v2811_v33 = vld [vmem:[#allocation35_spill] sm:$0xff] }
  0xc8   :  { %v2814_v38 = vld [vmem:[#allocation42_spill] sm:$0xff] }
  0xc9   :  { %v663_v53 = vpop.f32.mrf.mxu1  ;;  %694 = vmax.xlane.f32.xlu1 %v2421_v34 }
  0xca   :  { %v2817_v53 = vld [vmem:[#allocation44_spill] sm:$0xff] }
  0xcc   :  { %v677_v61 = vpop.f32.mrf.mxu2  ;;  %977 = vmatpush.bf16.xpose.msra.mxu0 %v1926_v29 }
  0xcd   :  { %991 = vmatpush.bf16.xpose.msra.mxu1 %v1949_v37  ;;  %1005 = vmatpush.bf16.xpose.msra.mxu2 %v1921_v28  ;;  %v2818_v61 = vld [vmem:[#allocation46_spill] sm:$0xff] }
  0xce   :  { %v691_v27 = vpop.f32.mrf.mxu3  ;;  %1019 = vmatpush.bf16.xpose.msra.mxu3 %v1942_v35 }
  0xcf   :  { %v2819_v27 = vld [vmem:[#allocation43_spill] sm:$0xff] }
  0xd4   :  { %978 = vmatpush.bf16.xpose.msra.mxu0 %v1977_v49 }
  0xd5   :  { %992 = vmatpush.bf16.xpose.msra.mxu1 %v1992_v52  ;;  %1006 = vmatpush.bf16.xpose.msra.mxu2 %v1972_v48 }
  0xd6   :  { %1020 = vmatpush.bf16.xpose.msra.mxu3 %v1987_v51 }
  0xdc   :  { %979 = vmatpush.bf16.xpose.msra.mxu0 %v2016_v8 }
  0xdd   :  { %993 = vmatpush.bf16.xpose.msra.mxu1 %v2030_v21  ;;  %1007 = vmatpush.bf16.xpose.msra.mxu2 %v2011_v63 }
  0xde   :  { %1021 = vmatpush.bf16.xpose.msra.mxu3 %v2023_v9 }
  0xe4   :  { %980 = vmatpush.bf16.xpose.msra.mxu0 %v2046_v31 }
  0xe5   :  { %994 = vmatpush.bf16.xpose.msra.mxu1 %v2058_v41  ;;  %1008 = vmatpush.bf16.xpose.msra.mxu2 %v2041_v30 }
  0xe6   :  { %1022 = vmatpush.bf16.xpose.msra.mxu3 %v2053_v40 }
  0xec   :  { %981 = vmatpush.bf16.xpose.msra.mxu0 %v2077_v50 }
  0xed   :  { %995 = vmatpush.bf16.xpose.msra.mxu1 %v2111_v10  ;;  %1009 = vmatpush.bf16.xpose.msra.mxu2 %v2065_v46 }
  0xee   :  { %1023 = vmatpush.bf16.xpose.msra.mxu3 %v2082_v54 }
  0xf4   :  { %1030 = vmatpush.bf16.xpose.msrb.mxu0 %v2089_v55 }
  0xf5   :  { %1044 = vmatpush.bf16.xpose.msrb.mxu1 %v2124_v25  ;;  %1058 = vmatpush.bf16.xpose.msrb.mxu2 %v2072_v47 }
  0xf6   :  { %1072 = vmatpush.bf16.xpose.msrb.mxu3 %v2100_v60 }
  0xfc   :  { %1031 = vmatpush.bf16.xpose.msrb.mxu0 %v2143_v56 }
  0xfd   :  { %1045 = vmatpush.bf16.xpose.msrb.mxu1 %v2156_v59  ;;  %1059 = vmatpush.bf16.xpose.msrb.mxu2 %v2795_v22 }
  0xfe   :  { %1073 = vmatpush.bf16.xpose.msrb.mxu3 %v2796_v15 }
 0x104   :  { %1032 = vmatpush.bf16.xpose.msrb.mxu0 %v2797_v19 }
 0x105   :  { %1046 = vmatpush.bf16.xpose.msrb.mxu1 %v2798_v58  ;;  %1060 = vmatpush.bf16.xpose.msrb.mxu2 %v2799_v23 }
 0x106   :  { %1074 = vmatpush.bf16.xpose.msrb.mxu3 %v2800_v42 }
 0x10c   :  { %1033 = vmatpush.bf16.xpose.msrb.mxu0 %v2801_v32 }
 0x10d   :  { %1047 = vmatpush.bf16.xpose.msrb.mxu1 %v2802_v20  ;;  %1061 = vmatpush.bf16.xpose.msrb.mxu2 %v2803_v16 }
 0x10e   :  { %1075 = vmatpush.bf16.xpose.msrb.mxu3 %v2804_v13 }
 0x114   :  { %1034 = vmatpush.bf16.xpose.msrb.mxu0 %v2805_v24 }
 0x115   :  { %1048 = vmatpush.bf16.xpose.msrb.mxu1 %v2806_v43  ;;  %1062 = vmatpush.bf16.xpose.msrb.mxu2 %v2807_v44 }
 0x116   :  { %1076 = vmatpush.bf16.xpose.msrb.mxu3 %v2808_v26 }
 0x11c   :  { %1035 = vmatpush.bf16.xpose.msrb.mxu0 %v2809_v36  ;;  %v2820_v36 = vld [vmem:[#allocation45_spill] sm:$0xff] }
 0x11d   :  { %1049 = vmatpush.bf16.xpose.msrb.mxu1 %v2810_v39  ;;  %1063 = vmatpush.bf16.xpose.msrb.mxu2 %v2811_v33 }
 0x11e   :  { %1077 = vmatpush.bf16.xpose.msrb.mxu3 %v2812_v62 }
 0x124   :  { %1036 = vmatpush.bf16.xpose.msrb.mxu0 %v2813_v57 }
 0x125   :  { %1050 = vmatpush.bf16.xpose.msrb.mxu1 %v2814_v38  ;;  %1064 = vmatpush.bf16.xpose.msrb.mxu2 %v2815_v45 }
 0x126   :  { %1078 = vmatpush.bf16.xpose.msrb.mxu3 %v2816_v14 }
 0x12c   :  { %1037 = vmatpush.bf16.xpose.msrb.mxu0 %v2817_v53 }
 0x12d   :  { %1051 = vmatpush.bf16.xpose.msrb.mxu1 %v2818_v61  ;;  %1065 = vmatpush.bf16.xpose.msrb.mxu2 %v2819_v27 }
 0x12e   :  { %1079 = vmatpush.bf16.xpose.msrb.mxu3 %v2820_v36 }
 0x12f   :  { %v840_v39 = vpop.f32.mrf.mxu0  ;;  %v854_v33 = vpop.f32.mrf.mxu1 }
 0x130   :  { %v855_v38 = vadd.f32 %v854_v33, %v840_v39 }
 0x136   :  { %v868_v26 = vpop.f32.mrf.mxu2  ;;  %v882_v62 = vpop.f32.mrf.mxu3 }
 0x137   :  { %v842_v44 = vpop.f32.mrf.mxu0  ;;  %v856_v57 = vpop.f32.mrf.mxu1  ;;  %v869_v24 = vadd.f32 %v868_v26, %v855_v38 }
 0x139   :  { %v883_v61 = vadd.f32 %v882_v62, %v869_v24 }
 0x13c   :  { %v695_v43 = vpop.xlane.xlu1 %694 }
 0x13d   :  { %v698_v45 = vsub.f32 %v2421_v34, %v695_v43 }
 0x13e   :  { %v870_v53 = vpop.f32.mrf.mxu2  ;;  %v884_v13 = vpop.f32.mrf.mxu3 }
 0x13f   :  { %v700_v14 = vmul.f32 1.442695, %v698_v45  ;;  %v896_v16 = vpop.f32.mrf.mxu0  ;;  %v910_v27 = vpop.f32.mrf.mxu1 }
 0x140   :  { %v897_v20 = vadd.f32 %v896_v16, %v883_v61 }
 0x141   :  { %1747 = vpow2.f32 %v700_v14 }
 0x142   :  { %v911_v32 = vadd.f32 %v910_v27, %v897_v20 }
 0x146   :  { %v938_v23 = vpop.f32.mrf.mxu3 }
 0x147   :  { %v1748_v36 = vpop.eup %1747  ;;  %v924_v42 = vpop.f32.mrf.mxu2 }
 0x148   :  { %704 = vadd.xlane.f32.xlu2 %v1748_v36  ;;  %v925_v44 = vadd.f32 %v924_v42, %v911_v32  ;;  %v898_v57 = vpop.f32.mrf.mxu0  ;;  %v912_v58 = vpop.f32.mrf.mxu1  ;;  %v713_v42 = vlaneseq }
 0x14a   :  { %v939_v39 = vadd.f32 %v938_v23, %v925_v44  ;;  %v2482_v58 = vshrl.u32 %v713_v42, 7 }
 0x14c   :  { %v943_v33 = vmul.f32 10.0, %v939_v39  ;;  %vm719_vm4 = vcmp.lt.s32.totalorder %v2482_v58, 2 }
 0x14d   :  { %vm2490_vm6 = vmpackc.low %vm1783_vm5, %vm719_vm4 }
 0x14e   :  { %v945_v43 = vadd.f32 %v943_v33, %v2421_v34  ;;  %v940_v38 = vpop.f32.mrf.mxu3 }
 0x14f   :  { %v926_v26 = vpop.f32.mrf.mxu2 }
 0x150   :  { %947 = vmax.xlane.f32.xlu1 %v945_v43 }
 0x1bb   :  { %v705_v45 = vpop.xlane.xlu2 %704 }
 0x1c3   :  { %v948_v13 = vpop.xlane.xlu1 %947 }
 0x1c4   :  { %v951_v24 = vsub.f32 %v945_v43, %v948_v13 }
 0x1c6   :  { %v953_v62 = vmul.f32 1.442695, %v951_v24 }
 0x1c8   :  { %1749 = vpow2.f32 %v953_v62 }
 0x1c9   :  { %1751 = vrcp.f32 %v705_v45 }
 0x1ce   :  { %v1750_v16 = vpop.eup %1749 }
 0x1cf   :  { %957 = vadd.xlane.f32.xlu2 %v1750_v16  ;;  %v1752_v32 = vpop.eup %1751 }
 0x1d0   :  { %v2484_v14 = vmul.f32 %v1752_v32, %v1748_v36 }
 0x1d2   :  { %vm1306_vm11 = vcmp.gt.f32.partialorder %v2484_v14, 0.0 }
 0x1d3   :  { %vm1310_vm12 = vmand %vm719_vm4, %vm1306_vm11 }
 0x242   :  { %v958_v20 = vpop.xlane.xlu2 %957 }
 0x243   :  { %1753 = vrcp.f32 %v958_v20 }
 0x249   :  { %v1754_v23 = vpop.eup %1753 }
 0x24a   :  { %v963_v53 = vmul.f32 %v1754_v23, %v1750_v16 }
 0x24c   :  { %v965_v61 = vsub.f32 %v963_v53, %v2484_v14 }
 0x24e   :  { %v1639_v44 = vpack.c.bf16 0.0, %v965_v61 }
 0x250   :  { %1640 = vmatmul.msk.bf16.vlgmr.msra.gmra.mxu0 %vm2490_vm6, %v1639_v44  ;;  %1643 = vmatmul.msk.bf16.vlgmr.msra.gmra.mxu1 %vm2490_vm6, %v1639_v44 }
 0x251   :  { %1646 = vmatmul.msk.bf16.vlgmr.msra.gmra.mxu2 %vm2490_vm6, %v1639_v44  ;;  %1649 = vmatmul.msk.bf16.vlgmr.msra.gmra.mxu3 %vm2490_vm6, %v1639_v44 }
 0x252   :  { %1172 = vmatpush.bf16.msra.mxu0 %v1818_v1  ;;  %1186 = vmatpush.bf16.msra.mxu1 %v1828_v3  ;;  %v2824_v1 = vld [vmem:[#allocation23_spill] sm:$0xff]  ;;  %v2826_v3 = vld [vmem:[#allocation28_spill] sm:$0xff] }
 0x253   :  { %1200 = vmatpush.bf16.msra.mxu2 %v1813_v0  ;;  %1214 = vmatpush.bf16.msra.mxu3 %v1823_v2  ;;  %v2823_v0 = vld [vmem:[#allocation26_spill] sm:$0xff]  ;;  %v2825_v2 = vld [vmem:[#allocation25_spill] sm:$0xff] }
 0x256   :  { %1173 = vmatpush.bf16.msra.mxu0 %v1840_v5  ;;  %1187 = vmatpush.bf16.msra.mxu1 %v1852_v7  ;;  %v2828_v5 = vld [vmem:[#allocation27_spill] sm:$0xff]  ;;  %v2830_v7 = vld [vmem:[#allocation32_spill] sm:$0xff] }
 0x257   :  { %1201 = vmatpush.bf16.msra.mxu2 %v1835_v4  ;;  %1215 = vmatpush.bf16.msra.mxu3 %v1847_v6  ;;  %v2827_v4 = vld [vmem:[#allocation30_spill] sm:$0xff]  ;;  %v2829_v6 = vld [vmem:[#allocation29_spill] sm:$0xff] }
 0x25a   :  { %1174 = vmatpush.bf16.msra.mxu0 %v1873_v12  ;;  %1188 = vmatpush.bf16.msra.mxu1 %v1893_v18  ;;  %v2832_v12 = vld [vmem:[#allocation31_spill] sm:$0xff]  ;;  %v2834_v18 = vld [vmem:[#allocation36_spill] sm:$0xff] }
 0x25b   :  { %1202 = vmatpush.bf16.msra.mxu2 %v1868_v11  ;;  %1216 = vmatpush.bf16.msra.mxu3 %v1888_v17  ;;  %v2831_v11 = vld [vmem:[#allocation34_spill] sm:$0xff]  ;;  %v2833_v17 = vld [vmem:[#allocation33_spill] sm:$0xff] }
 0x25e   :  { %1175 = vmatpush.bf16.msra.mxu0 %v1926_v29  ;;  %1189 = vmatpush.bf16.msra.mxu1 %v1949_v37  ;;  %v2836_v29 = vld [vmem:[#allocation35_spill] sm:$0xff]  ;;  %v2838_v37 = vld [vmem:[#allocation40_spill] sm:$0xff] }
 0x25f   :  { %1203 = vmatpush.bf16.msra.mxu2 %v1921_v28  ;;  %1217 = vmatpush.bf16.msra.mxu3 %v1942_v35  ;;  %v2835_v28 = vld [vmem:[#allocation38_spill] sm:$0xff]  ;;  %v2837_v35 = vld [vmem:[#allocation37_spill] sm:$0xff] }
 0x260   :  { %1652 = vmatmul.msk.bf16.vlgmr.msrb.gmra.mxu0 %vm2490_vm6, %v1639_v44  ;;  %1655 = vmatmul.msk.bf16.vlgmr.msrb.gmra.mxu1 %vm2490_vm6, %v1639_v44 }
 0x261   :  { %1658 = vmatmul.msk.bf16.vlgmr.msrb.gmra.mxu2 %vm2490_vm6, %v1639_v44  ;;  %1661 = vmatmul.msk.bf16.vlgmr.msrb.gmra.mxu3 %vm2490_vm6, %v1639_v44 }
 0x262   :  { %1176 = vmatpush.bf16.msra.mxu0 %v1977_v49  ;;  %1190 = vmatpush.bf16.msra.mxu1 %v1992_v52  ;;  %v2840_v49 = vld [vmem:[#allocation39_spill] sm:$0xff]  ;;  %v2842_v52 = vld [vmem:[#allocation44_spill] sm:$0xff] }
 0x263   :  { %1204 = vmatpush.bf16.msra.mxu2 %v1972_v48  ;;  %1218 = vmatpush.bf16.msra.mxu3 %v1987_v51  ;;  %v2839_v48 = vld [vmem:[#allocation42_spill] sm:$0xff]  ;;  %v2841_v51 = vld [vmem:[#allocation41_spill] sm:$0xff] }
 0x266   :  { %1177 = vmatpush.bf16.msra.mxu0 %v2016_v8  ;;  %1191 = vmatpush.bf16.msra.mxu1 %v2030_v21  ;;  %v2844_v8 = vld [vmem:[#allocation43_spill] sm:$0xff] }
 0x267   :  { %1205 = vmatpush.bf16.msra.mxu2 %v2011_v63  ;;  %1219 = vmatpush.bf16.msra.mxu3 %v2023_v9  ;;  %v2843_v63 = vld [vmem:[#allocation46_spill] sm:$0xff]  ;;  %v2845_v9 = vld [vmem:[#allocation45_spill] sm:$0xff] }
 0x26a   :  { %1178 = vmatpush.bf16.msra.mxu0 %v2046_v31  ;;  %1192 = vmatpush.bf16.msra.mxu1 %v2058_v41 }
 0x26b   :  { %1206 = vmatpush.bf16.msra.mxu2 %v2041_v30  ;;  %1220 = vmatpush.bf16.msra.mxu3 %v2053_v40 }
 0x26e   :  { %1179 = vmatpush.bf16.msra.mxu0 %v2077_v50  ;;  %1193 = vmatpush.bf16.msra.mxu1 %v2111_v10 }
 0x26f   :  { %1207 = vmatpush.bf16.msra.mxu2 %v2065_v46  ;;  %1221 = vmatpush.bf16.msra.mxu3 %v2082_v54 }
 0x272   :  { %1228 = vmatpush.bf16.msrb.mxu0 %v2089_v55  ;;  %1242 = vmatpush.bf16.msrb.mxu1 %v2124_v25 }
 0x273   :  { %1256 = vmatpush.bf16.msrb.mxu2 %v2072_v47  ;;  %1270 = vmatpush.bf16.msrb.mxu3 %v2100_v60 }
 0x276   :  { %1229 = vmatpush.bf16.msrb.mxu0 %v2143_v56  ;;  %1243 = vmatpush.bf16.msrb.mxu1 %v2156_v59 }
 0x277   :  { %1257 = vmatpush.bf16.msrb.mxu2 %v2795_v22  ;;  %1271 = vmatpush.bf16.msrb.mxu3 %v2796_v15 }
 0x27a   :  { %1230 = vmatpush.bf16.msrb.mxu0 %v2797_v19  ;;  %1244 = vmatpush.bf16.msrb.mxu1 %v2823_v0 }
 0x27b   :  { %1258 = vmatpush.bf16.msrb.mxu2 %v2824_v1  ;;  %1272 = vmatpush.bf16.msrb.mxu3 %v2825_v2 }
 0x27e   :  { %1231 = vmatpush.bf16.msrb.mxu0 %v2826_v3  ;;  %1245 = vmatpush.bf16.msrb.mxu1 %v2827_v4 }
 0x27f   :  { %1259 = vmatpush.bf16.msrb.mxu2 %v2828_v5  ;;  %1273 = vmatpush.bf16.msrb.mxu3 %v2829_v6 }
 0x282   :  { %1232 = vmatpush.bf16.msrb.mxu0 %v2830_v7  ;;  %1246 = vmatpush.bf16.msrb.mxu1 %v2831_v11 }
 0x283   :  { %1260 = vmatpush.bf16.msrb.mxu2 %v2832_v12  ;;  %1274 = vmatpush.bf16.msrb.mxu3 %v2833_v17 }
 0x286   :  { %1233 = vmatpush.bf16.msrb.mxu0 %v2834_v18  ;;  %1247 = vmatpush.bf16.msrb.mxu1 %v2835_v28 }
 0x287   :  { %1261 = vmatpush.bf16.msrb.mxu2 %v2836_v29  ;;  %1275 = vmatpush.bf16.msrb.mxu3 %v2837_v35 }
 0x28a   :  { %1234 = vmatpush.bf16.msrb.mxu0 %v2838_v37  ;;  %1248 = vmatpush.bf16.msrb.mxu1 %v2839_v48 }
 0x28b   :  { %1262 = vmatpush.bf16.msrb.mxu2 %v2840_v49  ;;  %1276 = vmatpush.bf16.msrb.mxu3 %v2841_v51 }
 0x28e   :  { %1235 = vmatpush.bf16.msrb.mxu0 %v2842_v52  ;;  %1249 = vmatpush.bf16.msrb.mxu1 %v2843_v63 }
 0x28f   :  { %1263 = vmatpush.bf16.msrb.mxu2 %v2844_v8  ;;  %1277 = vmatpush.bf16.msrb.mxu3 %v2845_v9 }
 0x2cd   :  { %v2574_v21 = vpop.f32.mrf.mxu0  ;;  %v2576_v30 = vpop.f32.mrf.mxu1 }
 0x2ce   :  { %v1086_v41 = vmul.f32 %v2574_v21, %v2574_v21  ;;  %v1087_v46 = vmul.f32 %v2576_v30, %v2576_v30 }
 0x2d0   :  { %v1102_v55 = vadd.f32 %v1087_v46, %v1086_v41 }
 0x2d4   :  { %v2578_v31 = vpop.f32.mrf.mxu2  ;;  %v2580_v40 = vpop.f32.mrf.mxu3 }
 0x2d5   :  { %v2586_v47 = vpop.f32.mrf.mxu0  ;;  %v2588_v50 = vpop.f32.mrf.mxu1  ;;  %v1088_v54 = vmul.f32 %v2578_v31, %v2578_v31  ;;  %v1089_v56 = vmul.f32 %v2580_v40, %v2580_v40 }
 0x2d6   :  { %v1094_v59 = vmul.f32 %v2586_v47, %v2586_v47  ;;  %v1095_v22 = vmul.f32 %v2588_v50, %v2588_v50 }
 0x2d7   :  { %v1103_v60 = vadd.f32 %v1102_v55, %v1088_v54 }
 0x2d8   :  { %v1111_v33 = vadd.f32 %v1095_v22, %v1094_v59 }
 0x2d9   :  { %v1104_v57 = vadd.f32 %v1103_v60, %v1089_v56 }
 0x2dc   :  { %v2592_v10 = vpop.f32.mrf.mxu2  ;;  %v2594_v25 = vpop.f32.mrf.mxu3 }
 0x2dd   :  { %v2602_v15 = vpop.f32.mrf.mxu0  ;;  %v2606_v36 = vpop.f32.mrf.mxu1  ;;  %v1096_v39 = vmul.f32 %v2592_v10, %v2592_v10  ;;  %v1097_v62 = vmul.f32 %v2594_v25, %v2594_v25 }
 0x2de   :  { %v1090_v19 = vmul.f32 %v2602_v15, %v2602_v15  ;;  %v1091_v38 = vmul.f32 %v2606_v36, %v2606_v36 }
 0x2df   :  { %v1112_v26 = vadd.f32 %v1111_v33, %v1096_v39 }
 0x2e0   :  { %v1105_v43 = vadd.f32 %v1104_v57, %v1090_v19 }
 0x2e1   :  { %v1113_v32 = vadd.f32 %v1112_v26, %v1097_v62 }
 0x2e2   :  { %v1106_v16 = vadd.f32 %v1105_v43, %v1091_v38 }
 0x2e4   :  { %v2612_v13 = vpop.f32.mrf.mxu2  ;;  %v2614_v24 = vpop.f32.mrf.mxu3 }
 0x2e5   :  { %v1092_v45 = vmul.f32 %v2612_v13, %v2612_v13  ;;  %v2620_v20 = vpop.f32.mrf.mxu0  ;;  %v1093_v23 = vmul.f32 %v2614_v24, %v2614_v24  ;;  %v2626_v61 = vpop.f32.mrf.mxu1 }
 0x2e6   :  { %v1098_v42 = vmul.f32 %v2620_v20, %v2620_v20  ;;  %v1099_v0 = vmul.f32 %v2626_v61, %v2626_v61 }
 0x2e7   :  { %v1107_v53 = vadd.f32 %v1106_v16, %v1092_v45 }
 0x2e8   :  { %v1114_v27 = vadd.f32 %v1113_v32, %v1098_v42 }
 0x2e9   :  { %v1108_v44 = vadd.f32 %v1107_v53, %v1093_v23 }
 0x2ea   :  { %v1115_v3 = vadd.f32 %v1114_v27, %v1099_v0 }
 0x2eb   :  { %1109 = vadd.xlane.f32.xlu0 %v1108_v44 }
 0x2ec   :  { %v1069_v1 = vpop.f32.mrf.mxu2  ;;  %v1083_v2 = vpop.f32.mrf.mxu3 }
 0x2ed   :  { %v1100_v4 = vmul.f32 %v1069_v1, %v1069_v1  ;;  %v1101_v5 = vmul.f32 %v1083_v2, %v1083_v2 }
 0x2ef   :  { %v1116_v6 = vadd.f32 %v1115_v3, %v1100_v4 }
 0x2f1   :  { %v1117_v7 = vadd.f32 %v1116_v6, %v1101_v5 }
 0x2f3   :  { %1118 = vadd.xlane.f32.xlu1 %v1117_v7 }
 0x35e   :  { %v1110_v11 = vpop.xlane.xlu0 %1109 }
 0x35f   :  { %1755 = vrsqrt.f32 %v1110_v11  ;;  %vm1127_vm7 = vcmp.eq.f32.partialorder %v1110_v11, inf  ;;  %v1130_v8 = vand.u32 2147483648, %v1110_v11  ;;  %vm1129_vm8 = vcmp.eq.f32.partialorder %v1110_v11, 0.0 }
 0x365   :  { %v1756_v12 = vpop.eup %1755 }
 0x366   :  { %v1121_v17 = vmul.f32 %v1756_v12, %v1110_v11  ;;  %v1119_v18 = vpop.xlane.xlu1 %1118 }
 0x367   :  { %1757 = vrsqrt.f32 %v1119_v18  ;;  %vm1139_vm9 = vcmp.eq.f32.partialorder %v1119_v18, inf  ;;  %v1142_v56 = vand.u32 2147483648, %v1119_v18  ;;  %vm1141_vm10 = vcmp.eq.f32.partialorder %v1119_v18, 0.0 }
 0x368   :  { %v1122_v28 = vmul.f32 %v1756_v12, %v1121_v17 }
 0x36a   :  { %v1123_v29 = vmul.f32 0.5, %v1122_v28 }
 0x36c   :  { %v1124_v35 = vsub.f32 1.5, %v1123_v29 }
 0x36d   :  { %v1758_v37 = vpop.eup %1757 }
 0x36e   :  { %v1125_v48 = vmul.f32 %v1756_v12, %v1124_v35  ;;  %v1133_v49 = vmul.f32 %v1758_v37, %v1119_v18 }
 0x370   :  { %v1126_v51 = vmul.f32 %v1125_v48, %v1110_v11  ;;  %v1134_v52 = vmul.f32 %v1758_v37, %v1133_v49 }
 0x372   :  { %v1128_v63 = vsel %vm1127_vm7, %v1110_v11, %v1126_v51  ;;  %v1135_v9 = vmul.f32 0.5, %v1134_v52 }
 0x373   :  { %v1131_v41 = vsel %vm1129_vm8, %v1130_v8, %v1128_v63 }
 0x374   :  { %v1136_v46 = vsub.f32 1.5, %v1135_v9  ;;  %v1144_v55 = vadd.f32 1e-08, %v1131_v41 }
 0x376   :  { %v1137_v54 = vmul.f32 %v1758_v37, %v1136_v46  ;;  %1759 = vrcp.f32 %v1144_v55 }
 0x378   :  { %v1138_v60 = vmul.f32 %v1137_v54, %v1119_v18  ;;  %v1308_v54 = vsel %vm1306_vm11, %v2484_v14, 1.0 }
 0x37a   :  { %v1140_v59 = vsel %vm1139_vm9, %v1119_v18, %v1138_v60 }
 0x37b   :  { %v1143_v22 = vsel %vm1141_vm10, %v1142_v56, %v1140_v59 }
 0x37c   :  { %v1145_v19 = vadd.f32 1e-08, %v1143_v22  ;;  %v1760_v57 = vpop.eup %1759 }
 0x37d   :  { %v1148_v33 = vmul.f32 %v1760_v57, %v2574_v21  ;;  %v1149_v43 = vmul.f32 %v1760_v57, %v2576_v30  ;;  %v1150_v26 = vmul.f32 %v1760_v57, %v2578_v31  ;;  %v1151_v38 = vmul.f32 %v1760_v57, %v2580_v40 }
 0x37e   :  { %1761 = vrcp.f32 %v1145_v19 }
 0x384   :  { %v1762_v39 = vpop.eup %1761 }
 0x385   :  { %v1156_v62 = vmul.f32 %v1762_v39, %v2586_v47  ;;  %v1157_v16 = vmul.f32 %v1762_v39, %v2588_v50  ;;  %v1158_v45 = vmul.f32 %v1762_v39, %v2592_v10  ;;  %v1159_v42 = vmul.f32 %v1762_v39, %v2594_v25 }
 0x386   :  { %v1160_v21 = vmul.f32 %v1762_v39, %v2620_v20  ;;  %v1161_v30 = vmul.f32 %v1762_v39, %v2626_v61  ;;  %v1162_v31 = vmul.f32 %v1762_v39, %v1069_v1  ;;  %v1163_v40 = vmul.f32 %v1762_v39, %v1083_v2 }
 0x387   :  { %v1164_v32 = vpack.c.bf16 %v1156_v62, %v1148_v33  ;;  %v1165_v23 = vpack.c.bf16 %v1157_v16, %v1149_v43  ;;  %v1166_v53 = vpack.c.bf16 %v1158_v45, %v1150_v26  ;;  %v1167_v27 = vpack.c.bf16 %v1159_v42, %v1151_v38 }
 0x388   :  { %v1152_v47 = vmul.f32 %v1760_v57, %v2602_v15  ;;  %v1153_v50 = vmul.f32 %v1760_v57, %v2606_v36  ;;  %v1154_v10 = vmul.f32 %v1760_v57, %v2612_v13  ;;  %v1155_v25 = vmul.f32 %v1760_v57, %v2614_v24 }
 0x389   :  { %1180 = vmatmul.bf16.vlgmr.msra.gmra.mxu0 %v1164_v32  ;;  %1194 = vmatmul.bf16.vlgmr.msra.gmra.mxu1 %v1165_v23 }
 0x38a   :  { %1208 = vmatmul.bf16.vlgmr.msra.gmra.mxu2 %v1166_v53  ;;  %1222 = vmatmul.bf16.vlgmr.msra.gmra.mxu3 %v1167_v27  ;;  %v1168_v44 = vpack.c.bf16 %v1160_v21, %v1152_v47  ;;  %v1169_v0 = vpack.c.bf16 %v1161_v30, %v1153_v50  ;;  %v1170_v3 = vpack.c.bf16 %v1162_v31, %v1154_v10 }
 0x38b   :  { %v1171_v4 = vpack.c.bf16 %v1163_v40, %v1155_v25 }
 0x399   :  { %1236 = vmatmul.bf16.vlgmr.msrb.gmra.mxu0 %v1168_v44  ;;  %1250 = vmatmul.bf16.vlgmr.msrb.gmra.mxu1 %v1169_v0 }
 0x39a   :  { %1264 = vmatmul.bf16.vlgmr.msrb.gmra.mxu2 %v1170_v3  ;;  %1278 = vmatmul.bf16.vlgmr.msrb.gmra.mxu3 %v1171_v4 }
 0x406   :  { %v1181_v20 = vpop.f32.mrf.mxu0  ;;  %v1195_v61 = vpop.f32.mrf.mxu1 }
 0x407   :  { %v1196_v6 = vadd.f32 %v1195_v61, %v1181_v20 }
 0x40d   :  { %v1209_v1 = vpop.f32.mrf.mxu2  ;;  %v1223_v2 = vpop.f32.mrf.mxu3 }
 0x40e   :  { %v1183_v5 = vpop.f32.mrf.mxu0  ;;  %v1197_v15 = vpop.f32.mrf.mxu1  ;;  %v1210_v36 = vadd.f32 %v1209_v1, %v1196_v6 }
 0x410   :  { %v1224_v11 = vadd.f32 %v1223_v2, %v1210_v36 }
 0x415   :  { %v1211_v7 = vpop.f32.mrf.mxu2  ;;  %v1225_v13 = vpop.f32.mrf.mxu3 }
 0x416   :  { %v1237_v24 = vpop.f32.mrf.mxu0  ;;  %v1251_v12 = vpop.f32.mrf.mxu1 }
 0x417   :  { %v1238_v17 = vadd.f32 %v1237_v24, %v1224_v11 }
 0x419   :  { %v1252_v18 = vadd.f32 %v1251_v12, %v1238_v17 }
 0x41d   :  { %v1265_v28 = vpop.f32.mrf.mxu2  ;;  %v1279_v29 = vpop.f32.mrf.mxu3 }
 0x41e   :  { %v1266_v35 = vadd.f32 %v1265_v28, %v1252_v18  ;;  %v1239_v37 = vpop.f32.mrf.mxu0  ;;  %v1253_v48 = vpop.f32.mrf.mxu1 }
 0x420   :  { %v1280_v49 = vadd.f32 %v1279_v29, %v1266_v35 }
 0x422   :  { %v1284_v51 = vadd.f32 %v1280_v49, %v2421_v34 }
 0x424   :  { %1286 = vmax.xlane.f32.xlu2 %v1284_v51 }
 0x425   :  { %v1267_v52 = vpop.f32.mrf.mxu2  ;;  %v1281_v63 = vpop.f32.mrf.mxu3 }
 0x497   :  { %v1287_v8 = vpop.xlane.xlu2 %1286 }
 0x498   :  { %v1290_v9 = vsub.f32 %v1284_v51, %v1287_v8 }
 0x49a   :  { %v1292_v41 = vmul.f32 1.442695, %v1290_v9 }
 0x49c   :  { %1763 = vpow2.f32 %v1292_v41 }
 0x49d   :  { %1765 = vlog2.f32 %v1308_v54 }
 0x4a2   :  { %v1764_v46 = vpop.eup %1763 }
 0x4a3   :  { %1296 = vadd.xlane.f32.xlu0 %v1764_v46  ;;  %v1766_v60 = vpop.eup %1765 }
 0x4a4   :  { %v1313_v22 = vmul.f32 0.6931472, %v1766_v60 }
 0x516   :  { %v1297_v55 = vpop.xlane.xlu0 %1296 }
 0x517   :  { %1767 = vlog2.f32 %v1297_v55 }
 0x51d   :  { %v1768_v56 = vpop.eup %1767 }
 0x51e   :  { %v1301_v59 = vmul.f32 0.6931472, %v1768_v56 }
 0x520   :  { %v1304_v34 = vsub.f32 %v1290_v9, %v1301_v59 }
 0x522   :  { %v1316_v19 = vsub.f32 %v1313_v22, %v1304_v34 }
 0x524   :  { %v1318_v57 = vmul.f32 %v1316_v19, %v2484_v14 }
 0x526   :  { %v1320_v39 = vsel %vm1310_vm12, %v1318_v57, 0.0 }
 0x527   :  { %1323 = vadd.xlane.f32.xlu1 %v1320_v39 }
 0x59a   :  { %v1324_v33 = vpop.xlane.xlu1 %1323 }
 0x59b   :  { %v1325_v43 = vrot.slane %v1324_v33, 4 }
 0x59d   :  { %v1326_v26 = vadd.f32 %v1325_v43, %v1324_v33 }
 0x59f   :  { %v1327_v38 = vrot.slane %v1326_v26, 2 }
 0x5a1   :  { %v1328_v62 = vadd.f32 %v1327_v38, %v1326_v26 }
 0x5a3   :  { %v1329_v16 = vrot.slane %v1328_v62, 1 }
 0x5a5   :  { %v1330_v45 = vadd.f32 %v1329_v16, %v1328_v62 }
 0x5a7   :  { %1734 = vpush %v1330_v45 }
 0x5d8   :  { %s1735_s6 = spop %1734 }
 0x5d9   :  { %s1332_s7 = smul.f32 0.5, %s1735_s6 }
 0x5db   :  { %1334 = sst [smem:[#allocation2]] %s1332_s7 }
 0x5dc   :  { %1343 = dma.smem_to_hbm %s1784_s8, 16, %s1341_s5, [#allocation3]  }
 0x5dd   :  { %1781 = dma.done.wait [#allocation3], 16  }
 0x5de   :  { %1782 = vsyncadd [#allocation3], 4294967280 }
 0x5df   :  { %1348 = sfence }
 0x5e0   :  { %1349 = vsyncpa [#allocation3], 1 }

</bundles_post_ra>
